<compile_context>
chip_gen: v5e
topology: v5e:2x2
jax: 0.10.0
libtpu: 0.0.40
codegen_flags: <defaults>
</compile_context>

<pallas_src>
import functools

import jax
import jax.numpy as jnp
import numpy as np
from jax import lax
from jax.experimental import pallas as pl
from jax.experimental.pallas import tpu as pltpu


def gru_recurrence_kernel(maxlen_ref, gi_ref, len_ref, whh_ref, bhh_ref,
                          out_ref, hid_ref, *, tt):
    """One grid step == TT time steps of the GRU recurrence for one batch tile.

    maxlen_ref : SMEM (1,)        int32 max(input_lengths) (scalar prefetch)
    gi_ref     : (TT, 3, TB, Hp)  gate-major precomputed x@W_ih^T + b_ih (gate order r,z,n)
    len_ref    : (TB, 1)          int32 sequence lengths (constant in t -> one DMA)
    whh_ref    : (3, Hp, Hp)      per-gate W_hh^T (resident, single DMA)
    bhh_ref    : (3, 1, Hp)       per-gate b_hh
    out_ref    : (TT, TB, Hp)     per-step outputs (zeroed where t >= length)
    hid_ref    : (1, TB, Hp)      resident hidden carry (block index constant across t)
    """
    t_idx = pl.program_id(1)
    t0 = t_idx * tt

    @pl.when(t_idx == 0)
    def _():
        # hidden=None in the PyTorch forward -> zero initial state (per batch tile)
        hid_ref[...] = jnp.zeros_like(hid_ref)

    max_len = maxlen_ref[0]

    @pl.when(t0 >= max_len)
    def _():
        # Entire TT block lies past the longest sequence: outputs are guaranteed zero
        # and the hidden carry is untouched -> skip the serialized recurrence.
        out_ref[...] = jnp.zeros_like(out_ref)

    @pl.when(t0 < max_len)
    def _():
        lengths = len_ref[...]                                      # (TB, 1) int32
        whh_r, whh_z, whh_n = whh_ref[0], whh_ref[1], whh_ref[2]    # (Hp, Hp) each
        bhh_r, bhh_z, bhh_n = bhh_ref[0], bhh_ref[1], bhh_ref[2]    # (1, Hp) each

        def body(step, h):
            gi = gi_ref[step].astype(jnp.float32)                   # (3, TB, Hp)
            hw = h.astype(whh_r.dtype)
            # TODO(synk): for small TB the per-step W_hh weight push dominates MXU time;
            # pltpu.matmul_push_rhs once per block + matmul_acc_lhs per step would reuse
            # the staged RHS across the TT steps.
            gh_r = jnp.dot(hw, whh_r, preferred_element_type=jnp.float32) + bhh_r
            gh_z = jnp.dot(hw, whh_z, preferred_element_type=jnp.float32) + bhh_z
            gh_n = jnp.dot(hw, whh_n, preferred_element_type=jnp.float32) + bhh_n
            # TODO(synk): on v6e/v7x the gate math below could run packed bf16 on the
            # VPU/EUP; kept f32 for v5e compatibility and exactness vs. the reference.
            r = jax.nn.sigmoid(gi[0] + gh_r)
            z = jax.nn.sigmoid(gi[1] + gh_z)
            n = jnp.tanh(gi[2] + r * gh_n)
            h_new = (1.0 - z) * n + z * h
            # pack_padded_sequence semantics: steps past each sequence's length do not
            # update the hidden state, and their outputs are padded with zeros.
            mask = (t0 + step < lengths).astype(jnp.float32)        # (TB, 1)
            out_masked = mask * h_new
            out_ref[step] = out_masked
            return out_masked + (1.0 - mask) * h

        # fori_loop with unroll=True keeps LLO scheduling visibility while bounding
        # vreg live ranges (a plain Python `for` would not).
        h = lax.fori_loop(0, tt, body, hid_ref[0], unroll=True)
        hid_ref[0] = h                         # single hidden store per TT steps


def encoder_rnn_forward(input_seqs, input_lengths, params, *, tt=8, tb=None,
                        weights_dtype=jnp.float32, gi_dtype=jnp.float32):
    """input_seqs: (T, B) int32; input_lengths: (B,) int; returns (output, hidden)."""
    emb_table = params["embedding"]                       # (vocab, H)
    wih, whh = params["w_ih"], params["w_hh"]             # (3H, H) each
    bih, bhh = params["b_ih"], params["b_hh"]             # (3H,) each

    T, B = input_seqs.shape
    H = emb_table.shape[1]

    # --- alignment: lane-dense hidden (Hp % 128 == 0) and sublane-dense batch ---
    Hp = pl.cdiv(H, 128) * 128
    Bp = pl.cdiv(B, 8) * 8
    if tb is None:
        tb = Bp                  # single batch tile by default; pass tb=Bp//2 on v7x
    else:
        tb = max(8, (int(tb) // 8) * 8)
        if Bp % tb != 0:
            tb = Bp

    tt = max(1, min(int(tt), T))
    T_pad = pl.cdiv(T, tt) * tt

    # --- hoisted, non-recurrent input projection: one big MXU-friendly XLA matmul ---
    embedded = jnp.take(emb_table, input_seqs, axis=0)                       # (T, B, H)
    gi = (jnp.dot(embedded.reshape(T * B, H).astype(weights_dtype),
                  wih.T.astype(weights_dtype),
                  preferred_element_type=jnp.float32)
          + bih.astype(jnp.float32))                                         # (T*B, 3H)
    # Gate-major layout (T, 3, B, H): each gate is its own lane-aligned slab, so the
    # kernel never slices the 3H lane axis at H / 2H inside the serial critical path.
    gi = gi.reshape(T, B, 3, H).transpose(0, 2, 1, 3)
    # Padded time steps / batch rows / hidden lanes are all-zero and provably inert.
    gi = jnp.pad(gi, ((0, T_pad - T), (0, 0), (0, Bp - B), (0, Hp - H)))
    gi = gi.astype(gi_dtype)     # bf16 gi halves the dominant HBM read / VMEM tenant

    lengths = jnp.pad(input_lengths.astype(jnp.int32), (0, Bp - B)).reshape(Bp, 1)
    max_len = jnp.max(input_lengths).astype(jnp.int32).reshape(1)

    # Per-gate recurrent weights, transposed and zero-padded: whh_g[k] = W_hk^T.
    whh_g = whh.reshape(3, H, H).transpose(0, 2, 1)
    whh_g = jnp.pad(whh_g, ((0, 0), (0, Hp - H), (0, Hp - H))).astype(weights_dtype)
    bhh_g = jnp.pad(bhh.reshape(3, 1, H),
                    ((0, 0), (0, 0), (0, Hp - H))).astype(jnp.float32)

    nb, nt = Bp // tb, T_pad // tt

    # Explicit VMEM budget: double-buffered gi/out blocks + resident operands + headroom,
    # clamped to 64 MiB so the same tile budget also fits v7x's smaller VMEM.
    gi_bytes = tt * 3 * tb * Hp * jnp.dtype(gi_dtype).itemsize
    out_bytes = tt * tb * Hp * 4
    res_bytes = (3 * Hp * Hp * jnp.dtype(weights_dtype).itemsize
                 + 3 * Hp * 4 + tb * 4 + tb * Hp * 4)
    vmem_limit = int(min(max(2 * (gi_bytes + out_bytes + res_bytes) + (8 << 20),
                             32 << 20), 64 << 20))

    kernel = functools.partial(gru_recurrence_kernel, tt=tt)

    out, hid = pl.pallas_call(
        kernel,
        out_shape=(jax.ShapeDtypeStruct((T_pad, Bp, Hp), jnp.float32),
                   jax.ShapeDtypeStruct((1, Bp, Hp), jnp.float32)),
        grid_spec=pltpu.PrefetchScalarGridSpec(
            num_scalar_prefetch=1,               # max_len -> SMEM
            grid=(nb, nt),                       # batch tiles parallel, time serial
            in_specs=[
                pl.BlockSpec((tt, 3, tb, Hp), lambda b, t, ml: (t, 0, b, 0)),  # gi
                pl.BlockSpec((tb, 1), lambda b, t, ml: (b, 0)),                # lengths
                pl.BlockSpec((3, Hp, Hp), lambda b, t, ml: (0, 0, 0)),         # W_hh^T
                pl.BlockSpec((3, 1, Hp), lambda b, t, ml: (0, 0, 0)),          # b_hh
            ],
            out_specs=(
                pl.BlockSpec((tt, tb, Hp), lambda b, t, ml: (t, b, 0)),        # output
                pl.BlockSpec((1, tb, Hp), lambda b, t, ml: (0, b, 0)),         # hidden
            ),
        ),
        compiler_params=pltpu.CompilerParams(
            dimension_semantics=("parallel", "arbitrary"),
            vmem_limit_bytes=vmem_limit),
    )(max_len, gi, lengths, whh_g, bhh_g)

    return out[:T, :B, :H], hid[:, :B, :H]


def ref_forward(input_seqs, input_lengths, params):
    """Pure-JAX reference of the same forward (masked GRU over padded seqs)."""
    emb = jnp.take(params["embedding"], input_seqs, axis=0).astype(jnp.float32)
    T, B, H = emb.shape
    Wih, Whh = params["w_ih"], params["w_hh"]
    bih, bhh = params["b_ih"], params["b_hh"]
    lengths = input_lengths.astype(jnp.int32)

    def step(h, xt_t):
        x, t = xt_t
        gi = x @ Wih.T + bih
        gh = h @ Whh.T + bhh
        r = jax.nn.sigmoid(gi[:, :H] + gh[:, :H])
        z = jax.nn.sigmoid(gi[:, H:2 * H] + gh[:, H:2 * H])
        n = jnp.tanh(gi[:, 2 * H:] + r * gh[:, 2 * H:])
        hn = (1.0 - z) * n + z * h
        mask = (t < lengths)[:, None].astype(jnp.float32)
        h_next = mask * hn + (1.0 - mask) * h
        return h_next, mask * hn

    h0 = jnp.zeros((B, H), jnp.float32)
    hT, outs = jax.lax.scan(step, h0, (emb, jnp.arange(T, dtype=jnp.int32)))
    return outs, hT[None]


def make_params(key, input_size, hidden_size):
    """Deterministic synthetic parameters matching nn.Embedding / nn.GRU shapes."""
    k_emb, k_wih, k_whh, k_bih, k_bhh = jax.random.split(key, 5)
    bound = 1.0 / np.sqrt(hidden_size)
    return {
        "embedding": jax.random.normal(k_emb, (input_size, hidden_size), jnp.float32),
        "w_ih": jax.random.uniform(k_wih, (3 * hidden_size, hidden_size),
                                   jnp.float32, -bound, bound),
        "w_hh": jax.random.uniform(k_whh, (3 * hidden_size, hidden_size),
                                   jnp.float32, -bound, bound),
        "b_ih": jax.random.uniform(k_bih, (3 * hidden_size,), jnp.float32, -bound, bound),
        "b_hh": jax.random.uniform(k_bhh, (3 * hidden_size,), jnp.float32, -bound, bound),
    }


if __name__ == "__main__":
    input_size = 20    # vocab
    hidden_size = 32
    T, B = 8, 2

    key = jax.random.PRNGKey(0)
    k_params, k_seq = jax.random.split(key)
    params = make_params(k_params, input_size, hidden_size)

    input_seqs = jax.random.randint(k_seq, (T, B), 0, input_size, dtype=jnp.int32)
    input_lengths = jnp.array([8, 5], dtype=jnp.int32)   # padded positions in col 1

    out, hid = encoder_rnn_forward(input_seqs, input_lengths, params, tt=8)
    out = jax.block_until_ready(out)
    hid = jax.block_until_ready(hid)

    ref_out, ref_hid = ref_forward(input_seqs, input_lengths, params)
    np.testing.assert_allclose(np.asarray(out), np.asarray(ref_out), atol=1e-5, rtol=1e-5)
    np.testing.assert_allclose(np.asarray(hid), np.asarray(ref_hid), atol=1e-5, rtol=1e-5)

    assert out.shape == (T, B, hidden_size)
    assert hid.shape == (1, B, hidden_size)

    # Production bf16 path (halves weight/gi HBM+VMEM, doubles MXU rate): verify it
    # compiles and produces finite values; looser numerics are expected, not asserted.
    out_bf, hid_bf = encoder_rnn_forward(input_seqs, input_lengths, params, tt=8,
                                         weights_dtype=jnp.bfloat16,
                                         gi_dtype=jnp.bfloat16)
    out_bf = jax.block_until_ready(out_bf)
    hid_bf = jax.block_until_ready(hid_bf)
    assert bool(jnp.isfinite(out_bf).all()) and bool(jnp.isfinite(hid_bf).all())

    print("KERNEL_OK")
</pallas_src>

<mosaic_0001>
module attributes {stable_mosaic.version = 11 : i64} {
  func.func @gru_recurrence_kernel(%arg0: i32, %arg1: i32, %arg2: memref<1xi32, #tpu.memory_space<smem>>, %arg3: memref<8x3x8x128xf32, #tpu.memory_space<vmem>>, %arg4: memref<8x1xi32, #tpu.memory_space<vmem>>, %arg5: memref<3x128x128xf32, #tpu.memory_space<vmem>>, %arg6: memref<3x1x128xf32, #tpu.memory_space<vmem>>, %arg7: memref<8x8x128xf32, #tpu.memory_space<vmem>>, %arg8: memref<1x8x128xf32, #tpu.memory_space<vmem>>) attributes {dimension_semantics = [#tpu.dimension_semantics<parallel>, #tpu.dimension_semantics<arbitrary>], iteration_bounds = array<i64: 1, 1>, scalar_prefetch = 1 : i64, scratch_operands = 0 : i64, tpu.core_type = #tpu.core_type<tc>, window_params = [{transform_indices = @transform_0, window_bounds = array<i64: 8, 3, 8, 128>}, {transform_indices = @transform_1, window_bounds = array<i64: 8, 1>}, {pipeline_mode = #tpu.pipeline_mode<synchronous>, transform_indices = @transform_2, window_bounds = array<i64: 3, 128, 128>}, {pipeline_mode = #tpu.pipeline_mode<synchronous>, transform_indices = @transform_3, window_bounds = array<i64: 3, 1, 128>}, {transform_indices = @transform_4, window_bounds = array<i64: 8, 8, 128>}, {transform_indices = @transform_5, window_bounds = array<i64: 1, 8, 128>}]} {
    %c8_i32 = arith.constant 8 : i32
    %0 = arith.muli %arg1, %c8_i32 : i32
    %c0_i32 = arith.constant 0 : i32
    %1 = arith.cmpi eq, %arg1, %c0_i32 : i32
    %2 = arith.extui %1 : i1 to i32
    %c0_i32_0 = arith.constant 0 : i32
    %3 = arith.cmpi ne, %2, %c0_i32_0 : i32
    scf.if %3 {
      %cst = arith.constant 0.000000e+00 : f32
      %11 = vector.broadcast %cst : f32 to vector<1x8x128xf32>
      %c0_3 = arith.constant 0 : index
      %c0_4 = arith.constant 0 : index
      %c0_5 = arith.constant 0 : index
      %12 = vector.load %arg8[%c0_3, %c0_4, %c0_5] : memref<1x8x128xf32, #tpu.memory_space<vmem>>, vector<1x8x128xf32>
      tpu.vector_store %arg8[%c0_3, %c0_4, %c0_5], %11 {strides = array<i32>} : memref<1x8x128xf32, #tpu.memory_space<vmem>>, vector<1x8x128xf32>,
    } else {
    }
    %c0 = arith.constant 0 : index
    %4 = memref.load %arg2[%c0] : memref<1xi32, #tpu.memory_space<smem>>
    %5 = arith.cmpi sge, %0, %4 : i32
    %6 = arith.extui %5 : i1 to i32
    %c0_i32_1 = arith.constant 0 : i32
    %7 = arith.cmpi ne, %6, %c0_i32_1 : i32
    scf.if %7 {
      %cst = arith.constant 0.000000e+00 : f32
      %11 = vector.broadcast %cst : f32 to vector<8x8x128xf32>
      %c0_3 = arith.constant 0 : index
      %c0_4 = arith.constant 0 : index
      %c0_5 = arith.constant 0 : index
      %12 = vector.load %arg7[%c0_3, %c0_4, %c0_5] : memref<8x8x128xf32, #tpu.memory_space<vmem>>, vector<8x8x128xf32>
      tpu.vector_store %arg7[%c0_3, %c0_4, %c0_5], %11 {strides = array<i32>} : memref<8x8x128xf32, #tpu.memory_space<vmem>>, vector<8x8x128xf32>,
    } else {
    }
    %8 = arith.cmpi slt, %0, %4 : i32
    %9 = arith.extui %8 : i1 to i32
    %c0_i32_2 = arith.constant 0 : i32
    %10 = arith.cmpi ne, %9, %c0_i32_2 : i32
    scf.if %10 {
      %c0_3 = arith.constant 0 : index
      %c0_4 = arith.constant 0 : index
      %11 = vector.load %arg4[%c0_3, %c0_4] : memref<8x1xi32, #tpu.memory_space<vmem>>, vector<8x1xi32>
      %c0_5 = arith.constant 0 : index
      %c0_6 = arith.constant 0 : index
      %c0_7 = arith.constant 0 : index
      %12 = vector.load %arg5[%c0_5, %c0_6, %c0_7] : memref<3x128x128xf32, #tpu.memory_space<vmem>>, vector<1x128x128xf32>
      %13 = vector.shape_cast %12 : vector<1x128x128xf32> to vector<128x128xf32>
      %c1 = arith.constant 1 : index
      %c0_8 = arith.constant 0 : index
      %c0_9 = arith.constant 0 : index
      %14 = vector.load %arg5[%c1, %c0_8, %c0_9] : memref<3x128x128xf32, #tpu.memory_space<vmem>>, vector<1x128x128xf32>
      %15 = vector.shape_cast %14 : vector<1x128x128xf32> to vector<128x128xf32>
      %c2 = arith.constant 2 : index
      %c0_10 = arith.constant 0 : index
      %c0_11 = arith.constant 0 : index
      %16 = vector.load %arg5[%c2, %c0_10, %c0_11] : memref<3x128x128xf32, #tpu.memory_space<vmem>>, vector<1x128x128xf32>
      %17 = vector.shape_cast %16 : vector<1x128x128xf32> to vector<128x128xf32>
      %c0_12 = arith.constant 0 : index
      %c0_13 = arith.constant 0 : index
      %c0_14 = arith.constant 0 : index
      %18 = vector.load %arg6[%c0_12, %c0_13, %c0_14] : memref<3x1x128xf32, #tpu.memory_space<vmem>>, vector<1x1x128xf32>
      %19 = vector.shape_cast %18 : vector<1x1x128xf32> to vector<1x128xf32>
      %c1_15 = arith.constant 1 : index
      %c0_16 = arith.constant 0 : index
      %c0_17 = arith.constant 0 : index
      %20 = vector.load %arg6[%c1_15, %c0_16, %c0_17] : memref<3x1x128xf32, #tpu.memory_space<vmem>>, vector<1x1x128xf32>
      %21 = vector.shape_cast %20 : vector<1x1x128xf32> to vector<1x128xf32>
      %c2_18 = arith.constant 2 : index
      %c0_19 = arith.constant 0 : index
      %c0_20 = arith.constant 0 : index
      %22 = vector.load %arg6[%c2_18, %c0_19, %c0_20] : memref<3x1x128xf32, #tpu.memory_space<vmem>>, vector<1x1x128xf32>
      %23 = vector.shape_cast %22 : vector<1x1x128xf32> to vector<1x128xf32>
      %c0_21 = arith.constant 0 : index
      %c0_22 = arith.constant 0 : index
      %c0_23 = arith.constant 0 : index
      %24 = vector.load %arg8[%c0_21, %c0_22, %c0_23] : memref<1x8x128xf32, #tpu.memory_space<vmem>>, vector<1x8x128xf32>
      %25 = vector.shape_cast %24 : vector<1x8x128xf32> to vector<8x128xf32>
      %c0_i32_24 = arith.constant 0 : i32
      %26 = arith.index_cast %c0_i32_24 : i32 to index
      %c0_25 = arith.constant 0 : index
      %c0_26 = arith.constant 0 : index
      %c0_27 = arith.constant 0 : index
      %27 = vector.load %arg3[%26, %c0_25, %c0_26, %c0_27] : memref<8x3x8x128xf32, #tpu.memory_space<vmem>>, vector<1x3x8x128xf32>
      %28 = vector.shape_cast %27 : vector<1x3x8x128xf32> to vector<3x8x128xf32>
      %cst = arith.constant dense<0.000000e+00> : vector<8x128xf32>
      %29 = tpu.matmul %25, %13, %cst {dimension_numbers = #tpu.dot_dimension_numbers<[1], [0], [0], [1], [0, 0, 1, 1], [], []>} : vector<8x128xf32>, vector<128x128xf32>, vector<8x128xf32> -> vector<8x128xf32>
      %30 = vector.broadcast %19 : vector<1x128xf32> to vector<8x128xf32>
      %31 = arith.addf %29, %30 : vector<8x128xf32>
      %cst_28 = arith.constant dense<0.000000e+00> : vector<8x128xf32>
      %32 = tpu.matmul %25, %15, %cst_28 {dimension_numbers = #tpu.dot_dimension_numbers<[1], [0], [0], [1], [0, 0, 1, 1], [], []>} : vector<8x128xf32>, vector<128x128xf32>, vector<8x128xf32> -> vector<8x128xf32>
      %33 = vector.broadcast %21 : vector<1x128xf32> to vector<8x128xf32>
      %34 = arith.addf %32, %33 : vector<8x128xf32>
      %cst_29 = arith.constant dense<0.000000e+00> : vector<8x128xf32>
      %35 = tpu.matmul %25, %17, %cst_29 {dimension_numbers = #tpu.dot_dimension_numbers<[1], [0], [0], [1], [0, 0, 1, 1], [], []>} : vector<8x128xf32>, vector<128x128xf32>, vector<8x128xf32> -> vector<8x128xf32>
      %36 = vector.broadcast %23 : vector<1x128xf32> to vector<8x128xf32>
      %37 = arith.addf %35, %36 : vector<8x128xf32>
      %38 = vector.extract_strided_slice %28 {offsets = [0, 0, 0], sizes = [1, 8, 128], strides = [1, 1, 1]} : vector<3x8x128xf32> to vector<1x8x128xf32>
      %39 = vector.shape_cast %38 : vector<1x8x128xf32> to vector<8x128xf32>
      %40 = arith.addf %39, %31 : vector<8x128xf32>
      %41 = arith.negf %40 : vector<8x128xf32>
      %42 = math.exp %41 : vector<8x128xf32>
      %cst_30 = arith.constant 1.000000e+00 : f32
      %43 = vector.broadcast %cst_30 : f32 to vector<8x128xf32>
      %44 = arith.addf %43, %42 : vector<8x128xf32>
      %45 = arith.divf %43, %44 : vector<8x128xf32>
      %46 = vector.extract_strided_slice %28 {offsets = [1, 0, 0], sizes = [1, 8, 128], strides = [1, 1, 1]} : vector<3x8x128xf32> to vector<1x8x128xf32>
      %47 = vector.shape_cast %46 : vector<1x8x128xf32> to vector<8x128xf32>
      %48 = arith.addf %47, %34 : vector<8x128xf32>
      %49 = arith.negf %48 : vector<8x128xf32>
      %50 = math.exp %49 : vector<8x128xf32>
      %cst_31 = arith.constant 1.000000e+00 : f32
      %51 = vector.broadcast %cst_31 : f32 to vector<8x128xf32>
      %52 = arith.addf %51, %50 : vector<8x128xf32>
      %53 = arith.divf %51, %52 : vector<8x128xf32>
      %54 = vector.extract_strided_slice %28 {offsets = [2, 0, 0], sizes = [1, 8, 128], strides = [1, 1, 1]} : vector<3x8x128xf32> to vector<1x8x128xf32>
      %55 = vector.shape_cast %54 : vector<1x8x128xf32> to vector<8x128xf32>
      %56 = arith.mulf %45, %37 : vector<8x128xf32>
      %57 = arith.addf %55, %56 : vector<8x128xf32>
      %58 = math.tanh %57 : vector<8x128xf32>
      %cst_32 = arith.constant 1.000000e+00 : f32
      %59 = vector.broadcast %cst_32 : f32 to vector<8x128xf32>
      %60 = arith.subf %59, %53 : vector<8x128xf32>
      %61 = arith.mulf %60, %58 : vector<8x128xf32>
      %62 = arith.mulf %53, %25 : vector<8x128xf32>
      %63 = arith.addf %61, %62 : vector<8x128xf32>
      %64 = arith.addi %0, %c0_i32_24 : i32
      %65 = vector.broadcast %64 : i32 to vector<8x1xi32>
      %66 = arith.cmpi slt, %65, %11 : vector<8x1xi32>
      %67 = arith.extui %66 : vector<8x1xi1> to vector<8x1xi32>
      %68 = arith.sitofp %67 : vector<8x1xi32> to vector<8x1xf32>
      %69 = vector.broadcast %68 : vector<8x1xf32> to vector<8x128xf32>
      %70 = arith.mulf %69, %63 : vector<8x128xf32>
      %71 = arith.index_cast %c0_i32_24 : i32 to index
      %c0_33 = arith.constant 0 : index
      %c0_34 = arith.constant 0 : index
      %72 = vector.load %arg7[%71, %c0_33, %c0_34] : memref<8x8x128xf32, #tpu.memory_space<vmem>>, vector<1x8x128xf32>
      %73 = vector.shape_cast %72 : vector<1x8x128xf32> to vector<8x128xf32>
      %74 = vector.shape_cast %70 : vector<8x128xf32> to vector<1x8x128xf32>
      tpu.vector_store %arg7[%71, %c0_33, %c0_34], %74 {strides = array<i32>} : memref<8x8x128xf32, #tpu.memory_space<vmem>>, vector<1x8x128xf32>,
      %cst_35 = arith.constant 1.000000e+00 : f32
      %75 = vector.broadcast %cst_35 : f32 to vector<8x1xf32>
      %76 = arith.subf %75, %68 : vector<8x1xf32>
      %77 = vector.broadcast %76 : vector<8x1xf32> to vector<8x128xf32>
      %78 = arith.mulf %77, %25 : vector<8x128xf32>
      %79 = arith.addf %70, %78 : vector<8x128xf32>
      %c1_i32 = arith.constant 1 : i32
      %80 = arith.index_cast %c1_i32 : i32 to index
      %c0_36 = arith.constant 0 : index
      %c0_37 = arith.constant 0 : index
      %c0_38 = arith.constant 0 : index
      %81 = vector.load %arg3[%80, %c0_36, %c0_37, %c0_38] : memref<8x3x8x128xf32, #tpu.memory_space<vmem>>, vector<1x3x8x128xf32>
      %82 = vector.shape_cast %81 : vector<1x3x8x128xf32> to vector<3x8x128xf32>
      %cst_39 = arith.constant dense<0.000000e+00> : vector<8x128xf32>
      %83 = tpu.matmul %79, %13, %cst_39 {dimension_numbers = #tpu.dot_dimension_numbers<[1], [0], [0], [1], [0, 0, 1, 1], [], []>} : vector<8x128xf32>, vector<128x128xf32>, vector<8x128xf32> -> vector<8x128xf32>
      %84 = vector.broadcast %19 : vector<1x128xf32> to vector<8x128xf32>
      %85 = arith.addf %83, %84 : vector<8x128xf32>
      %cst_40 = arith.constant dense<0.000000e+00> : vector<8x128xf32>
      %86 = tpu.matmul %79, %15, %cst_40 {dimension_numbers = #tpu.dot_dimension_numbers<[1], [0], [0], [1], [0, 0, 1, 1], [], []>} : vector<8x128xf32>, vector<128x128xf32>, vector<8x128xf32> -> vector<8x128xf32>
      %87 = vector.broadcast %21 : vector<1x128xf32> to vector<8x128xf32>
      %88 = arith.addf %86, %87 : vector<8x128xf32>
      %cst_41 = arith.constant dense<0.000000e+00> : vector<8x128xf32>
      %89 = tpu.matmul %79, %17, %cst_41 {dimension_numbers = #tpu.dot_dimension_numbers<[1], [0], [0], [1], [0, 0, 1, 1], [], []>} : vector<8x128xf32>, vector<128x128xf32>, vector<8x128xf32> -> vector<8x128xf32>
      %90 = vector.broadcast %23 : vector<1x128xf32> to vector<8x128xf32>
      %91 = arith.addf %89, %90 : vector<8x128xf32>
      %92 = vector.extract_strided_slice %82 {offsets = [0, 0, 0], sizes = [1, 8, 128], strides = [1, 1, 1]} : vector<3x8x128xf32> to vector<1x8x128xf32>
      %93 = vector.shape_cast %92 : vector<1x8x128xf32> to vector<8x128xf32>
      %94 = arith.addf %93, %85 : vector<8x128xf32>
      %95 = arith.negf %94 : vector<8x128xf32>
      %96 = math.exp %95 : vector<8x128xf32>
      %cst_42 = arith.constant 1.000000e+00 : f32
      %97 = vector.broadcast %cst_42 : f32 to vector<8x128xf32>
      %98 = arith.addf %97, %96 : vector<8x128xf32>
      %99 = arith.divf %97, %98 : vector<8x128xf32>
      %100 = vector.extract_strided_slice %82 {offsets = [1, 0, 0], sizes = [1, 8, 128], strides = [1, 1, 1]} : vector<3x8x128xf32> to vector<1x8x128xf32>
      %101 = vector.shape_cast %100 : vector<1x8x128xf32> to vector<8x128xf32>
      %102 = arith.addf %101, %88 : vector<8x128xf32>
      %103 = arith.negf %102 : vector<8x128xf32>
      %104 = math.exp %103 : vector<8x128xf32>
      %cst_43 = arith.constant 1.000000e+00 : f32
      %105 = vector.broadcast %cst_43 : f32 to vector<8x128xf32>
      %106 = arith.addf %105, %104 : vector<8x128xf32>
      %107 = arith.divf %105, %106 : vector<8x128xf32>
      %108 = vector.extract_strided_slice %82 {offsets = [2, 0, 0], sizes = [1, 8, 128], strides = [1, 1, 1]} : vector<3x8x128xf32> to vector<1x8x128xf32>
      %109 = vector.shape_cast %108 : vector<1x8x128xf32> to vector<8x128xf32>
      %110 = arith.mulf %99, %91 : vector<8x128xf32>
      %111 = arith.addf %109, %110 : vector<8x128xf32>
      %112 = math.tanh %111 : vector<8x128xf32>
      %cst_44 = arith.constant 1.000000e+00 : f32
      %113 = vector.broadcast %cst_44 : f32 to vector<8x128xf32>
      %114 = arith.subf %113, %107 : vector<8x128xf32>
      %115 = arith.mulf %114, %112 : vector<8x128xf32>
      %116 = arith.mulf %107, %79 : vector<8x128xf32>
      %117 = arith.addf %115, %116 : vector<8x128xf32>
      %118 = arith.addi %0, %c1_i32 : i32
      %119 = vector.broadcast %118 : i32 to vector<8x1xi32>
      %120 = arith.cmpi slt, %119, %11 : vector<8x1xi32>
      %121 = arith.extui %120 : vector<8x1xi1> to vector<8x1xi32>
      %122 = arith.sitofp %121 : vector<8x1xi32> to vector<8x1xf32>
      %123 = vector.broadcast %122 : vector<8x1xf32> to vector<8x128xf32>
      %124 = arith.mulf %123, %117 : vector<8x128xf32>
      %125 = arith.index_cast %c1_i32 : i32 to index
      %c0_45 = arith.constant 0 : index
      %c0_46 = arith.constant 0 : index
      %126 = vector.load %arg7[%125, %c0_45, %c0_46] : memref<8x8x128xf32, #tpu.memory_space<vmem>>, vector<1x8x128xf32>
      %127 = vector.shape_cast %126 : vector<1x8x128xf32> to vector<8x128xf32>
      %128 = vector.shape_cast %124 : vector<8x128xf32> to vector<1x8x128xf32>
      tpu.vector_store %arg7[%125, %c0_45, %c0_46], %128 {strides = array<i32>} : memref<8x8x128xf32, #tpu.memory_space<vmem>>, vector<1x8x128xf32>,
      %cst_47 = arith.constant 1.000000e+00 : f32
      %129 = vector.broadcast %cst_47 : f32 to vector<8x1xf32>
      %130 = arith.subf %129, %122 : vector<8x1xf32>
      %131 = vector.broadcast %130 : vector<8x1xf32> to vector<8x128xf32>
      %132 = arith.mulf %131, %79 : vector<8x128xf32>
      %133 = arith.addf %124, %132 : vector<8x128xf32>
      %c2_i32 = arith.constant 2 : i32
      %134 = arith.index_cast %c2_i32 : i32 to index
      %c0_48 = arith.constant 0 : index
      %c0_49 = arith.constant 0 : index
      %c0_50 = arith.constant 0 : index
      %135 = vector.load %arg3[%134, %c0_48, %c0_49, %c0_50] : memref<8x3x8x128xf32, #tpu.memory_space<vmem>>, vector<1x3x8x128xf32>
      %136 = vector.shape_cast %135 : vector<1x3x8x128xf32> to vector<3x8x128xf32>
      %cst_51 = arith.constant dense<0.000000e+00> : vector<8x128xf32>
      %137 = tpu.matmul %133, %13, %cst_51 {dimension_numbers = #tpu.dot_dimension_numbers<[1], [0], [0], [1], [0, 0, 1, 1], [], []>} : vector<8x128xf32>, vector<128x128xf32>, vector<8x128xf32> -> vector<8x128xf32>
      %138 = vector.broadcast %19 : vector<1x128xf32> to vector<8x128xf32>
      %139 = arith.addf %137, %138 : vector<8x128xf32>
      %cst_52 = arith.constant dense<0.000000e+00> : vector<8x128xf32>
      %140 = tpu.matmul %133, %15, %cst_52 {dimension_numbers = #tpu.dot_dimension_numbers<[1], [0], [0], [1], [0, 0, 1, 1], [], []>} : vector<8x128xf32>, vector<128x128xf32>, vector<8x128xf32> -> vector<8x128xf32>
      %141 = vector.broadcast %21 : vector<1x128xf32> to vector<8x128xf32>
      %142 = arith.addf %140, %141 : vector<8x128xf32>
      %cst_53 = arith.constant dense<0.000000e+00> : vector<8x128xf32>
      %143 = tpu.matmul %133, %17, %cst_53 {dimension_numbers = #tpu.dot_dimension_numbers<[1], [0], [0], [1], [0, 0, 1, 1], [], []>} : vector<8x128xf32>, vector<128x128xf32>, vector<8x128xf32> -> vector<8x128xf32>
      %144 = vector.broadcast %23 : vector<1x128xf32> to vector<8x128xf32>
      %145 = arith.addf %143, %144 : vector<8x128xf32>
      %146 = vector.extract_strided_slice %136 {offsets = [0, 0, 0], sizes = [1, 8, 128], strides = [1, 1, 1]} : vector<3x8x128xf32> to vector<1x8x128xf32>
      %147 = vector.shape_cast %146 : vector<1x8x128xf32> to vector<8x128xf32>
      %148 = arith.addf %147, %139 : vector<8x128xf32>
      %149 = arith.negf %148 : vector<8x128xf32>
      %150 = math.exp %149 : vector<8x128xf32>
      %cst_54 = arith.constant 1.000000e+00 : f32
      %151 = vector.broadcast %cst_54 : f32 to vector<8x128xf32>
      %152 = arith.addf %151, %150 : vector<8x128xf32>
      %153 = arith.divf %151, %152 : vector<8x128xf32>
      %154 = vector.extract_strided_slice %136 {offsets = [1, 0, 0], sizes = [1, 8, 128], strides = [1, 1, 1]} : vector<3x8x128xf32> to vector<1x8x128xf32>
      %155 = vector.shape_cast %154 : vector<1x8x128xf32> to vector<8x128xf32>
      %156 = arith.addf %155, %142 : vector<8x128xf32>
      %157 = arith.negf %156 : vector<8x128xf32>
      %158 = math.exp %157 : vector<8x128xf32>
      %cst_55 = arith.constant 1.000000e+00 : f32
      %159 = vector.broadcast %cst_55 : f32 to vector<8x128xf32>
      %160 = arith.addf %159, %158 : vector<8x128xf32>
      %161 = arith.divf %159, %160 : vector<8x128xf32>
      %162 = vector.extract_strided_slice %136 {offsets = [2, 0, 0], sizes = [1, 8, 128], strides = [1, 1, 1]} : vector<3x8x128xf32> to vector<1x8x128xf32>
      %163 = vector.shape_cast %162 : vector<1x8x128xf32> to vector<8x128xf32>
      %164 = arith.mulf %153, %145 : vector<8x128xf32>
      %165 = arith.addf %163, %164 : vector<8x128xf32>
      %166 = math.tanh %165 : vector<8x128xf32>
      %cst_56 = arith.constant 1.000000e+00 : f32
      %167 = vector.broadcast %cst_56 : f32 to vector<8x128xf32>
      %168 = arith.subf %167, %161 : vector<8x128xf32>
      %169 = arith.mulf %168, %166 : vector<8x128xf32>
      %170 = arith.mulf %161, %133 : vector<8x128xf32>
      %171 = arith.addf %169, %170 : vector<8x128xf32>
      %172 = arith.addi %0, %c2_i32 : i32
      %173 = vector.broadcast %172 : i32 to vector<8x1xi32>
      %174 = arith.cmpi slt, %173, %11 : vector<8x1xi32>
      %175 = arith.extui %174 : vector<8x1xi1> to vector<8x1xi32>
      %176 = arith.sitofp %175 : vector<8x1xi32> to vector<8x1xf32>
      %177 = vector.broadcast %176 : vector<8x1xf32> to vector<8x128xf32>
      %178 = arith.mulf %177, %171 : vector<8x128xf32>
      %179 = arith.index_cast %c2_i32 : i32 to index
      %c0_57 = arith.constant 0 : index
      %c0_58 = arith.constant 0 : index
      %180 = vector.load %arg7[%179, %c0_57, %c0_58] : memref<8x8x128xf32, #tpu.memory_space<vmem>>, vector<1x8x128xf32>
      %181 = vector.shape_cast %180 : vector<1x8x128xf32> to vector<8x128xf32>
      %182 = vector.shape_cast %178 : vector<8x128xf32> to vector<1x8x128xf32>
      tpu.vector_store %arg7[%179, %c0_57, %c0_58], %182 {strides = array<i32>} : memref<8x8x128xf32, #tpu.memory_space<vmem>>, vector<1x8x128xf32>,
      %cst_59 = arith.constant 1.000000e+00 : f32
      %183 = vector.broadcast %cst_59 : f32 to vector<8x1xf32>
      %184 = arith.subf %183, %176 : vector<8x1xf32>
      %185 = vector.broadcast %184 : vector<8x1xf32> to vector<8x128xf32>
      %186 = arith.mulf %185, %133 : vector<8x128xf32>
      %187 = arith.addf %178, %186 : vector<8x128xf32>
      %c3_i32 = arith.constant 3 : i32
      %188 = arith.index_cast %c3_i32 : i32 to index
      %c0_60 = arith.constant 0 : index
      %c0_61 = arith.constant 0 : index
      %c0_62 = arith.constant 0 : index
      %189 = vector.load %arg3[%188, %c0_60, %c0_61, %c0_62] : memref<8x3x8x128xf32, #tpu.memory_space<vmem>>, vector<1x3x8x128xf32>
      %190 = vector.shape_cast %189 : vector<1x3x8x128xf32> to vector<3x8x128xf32>
      %cst_63 = arith.constant dense<0.000000e+00> : vector<8x128xf32>
      %191 = tpu.matmul %187, %13, %cst_63 {dimension_numbers = #tpu.dot_dimension_numbers<[1], [0], [0], [1], [0, 0, 1, 1], [], []>} : vector<8x128xf32>, vector<128x128xf32>, vector<8x128xf32> -> vector<8x128xf32>
      %192 = vector.broadcast %19 : vector<1x128xf32> to vector<8x128xf32>
      %193 = arith.addf %191, %192 : vector<8x128xf32>
      %cst_64 = arith.constant dense<0.000000e+00> : vector<8x128xf32>
      %194 = tpu.matmul %187, %15, %cst_64 {dimension_numbers = #tpu.dot_dimension_numbers<[1], [0], [0], [1], [0, 0, 1, 1], [], []>} : vector<8x128xf32>, vector<128x128xf32>, vector<8x128xf32> -> vector<8x128xf32>
      %195 = vector.broadcast %21 : vector<1x128xf32> to vector<8x128xf32>
      %196 = arith.addf %194, %195 : vector<8x128xf32>
      %cst_65 = arith.constant dense<0.000000e+00> : vector<8x128xf32>
      %197 = tpu.matmul %187, %17, %cst_65 {dimension_numbers = #tpu.dot_dimension_numbers<[1], [0], [0], [1], [0, 0, 1, 1], [], []>} : vector<8x128xf32>, vector<128x128xf32>, vector<8x128xf32> -> vector<8x128xf32>
      %198 = vector.broadcast %23 : vector<1x128xf32> to vector<8x128xf32>
      %199 = arith.addf %197, %198 : vector<8x128xf32>
      %200 = vector.extract_strided_slice %190 {offsets = [0, 0, 0], sizes = [1, 8, 128], strides = [1, 1, 1]} : vector<3x8x128xf32> to vector<1x8x128xf32>
      %201 = vector.shape_cast %200 : vector<1x8x128xf32> to vector<8x128xf32>
      %202 = arith.addf %201, %193 : vector<8x128xf32>
      %203 = arith.negf %202 : vector<8x128xf32>
      %204 = math.exp %203 : vector<8x128xf32>
      %cst_66 = arith.constant 1.000000e+00 : f32
      %205 = vector.broadcast %cst_66 : f32 to vector<8x128xf32>
      %206 = arith.addf %205, %204 : vector<8x128xf32>
      %207 = arith.divf %205, %206 : vector<8x128xf32>
      %208 = vector.extract_strided_slice %190 {offsets = [1, 0, 0], sizes = [1, 8, 128], strides = [1, 1, 1]} : vector<3x8x128xf32> to vector<1x8x128xf32>
      %209 = vector.shape_cast %208 : vector<1x8x128xf32> to vector<8x128xf32>
      %210 = arith.addf %209, %196 : vector<8x128xf32>
      %211 = arith.negf %210 : vector<8x128xf32>
      %212 = math.exp %211 : vector<8x128xf32>
      %cst_67 = arith.constant 1.000000e+00 : f32
      %213 = vector.broadcast %cst_67 : f32 to vector<8x128xf32>
      %214 = arith.addf %213, %212 : vector<8x128xf32>
      %215 = arith.divf %213, %214 : vector<8x128xf32>
      %216 = vector.extract_strided_slice %190 {offsets = [2, 0, 0], sizes = [1, 8, 128], strides = [1, 1, 1]} : vector<3x8x128xf32> to vector<1x8x128xf32>
      %217 = vector.shape_cast %216 : vector<1x8x128xf32> to vector<8x128xf32>
      %218 = arith.mulf %207, %199 : vector<8x128xf32>
      %219 = arith.addf %217, %218 : vector<8x128xf32>
      %220 = math.tanh %219 : vector<8x128xf32>
      %cst_68 = arith.constant 1.000000e+00 : f32
      %221 = vector.broadcast %cst_68 : f32 to vector<8x128xf32>
      %222 = arith.subf %221, %215 : vector<8x128xf32>
      %223 = arith.mulf %222, %220 : vector<8x128xf32>
      %224 = arith.mulf %215, %187 : vector<8x128xf32>
      %225 = arith.addf %223, %224 : vector<8x128xf32>
      %226 = arith.addi %0, %c3_i32 : i32
      %227 = vector.broadcast %226 : i32 to vector<8x1xi32>
      %228 = arith.cmpi slt, %227, %11 : vector<8x1xi32>
      %229 = arith.extui %228 : vector<8x1xi1> to vector<8x1xi32>
      %230 = arith.sitofp %229 : vector<8x1xi32> to vector<8x1xf32>
      %231 = vector.broadcast %230 : vector<8x1xf32> to vector<8x128xf32>
      %232 = arith.mulf %231, %225 : vector<8x128xf32>
      %233 = arith.index_cast %c3_i32 : i32 to index
      %c0_69 = arith.constant 0 : index
      %c0_70 = arith.constant 0 : index
      %234 = vector.load %arg7[%233, %c0_69, %c0_70] : memref<8x8x128xf32, #tpu.memory_space<vmem>>, vector<1x8x128xf32>
      %235 = vector.shape_cast %234 : vector<1x8x128xf32> to vector<8x128xf32>
      %236 = vector.shape_cast %232 : vector<8x128xf32> to vector<1x8x128xf32>
      tpu.vector_store %arg7[%233, %c0_69, %c0_70], %236 {strides = array<i32>} : memref<8x8x128xf32, #tpu.memory_space<vmem>>, vector<1x8x128xf32>,
      %cst_71 = arith.constant 1.000000e+00 : f32
      %237 = vector.broadcast %cst_71 : f32 to vector<8x1xf32>
      %238 = arith.subf %237, %230 : vector<8x1xf32>
      %239 = vector.broadcast %238 : vector<8x1xf32> to vector<8x128xf32>
      %240 = arith.mulf %239, %187 : vector<8x128xf32>
      %241 = arith.addf %232, %240 : vector<8x128xf32>
      %c4_i32 = arith.constant 4 : i32
      %242 = arith.index_cast %c4_i32 : i32 to index
      %c0_72 = arith.constant 0 : index
      %c0_73 = arith.constant 0 : index
      %c0_74 = arith.constant 0 : index
      %243 = vector.load %arg3[%242, %c0_72, %c0_73, %c0_74] : memref<8x3x8x128xf32, #tpu.memory_space<vmem>>, vector<1x3x8x128xf32>
      %244 = vector.shape_cast %243 : vector<1x3x8x128xf32> to vector<3x8x128xf32>
      %cst_75 = arith.constant dense<0.000000e+00> : vector<8x128xf32>
      %245 = tpu.matmul %241, %13, %cst_75 {dimension_numbers = #tpu.dot_dimension_numbers<[1], [0], [0], [1], [0, 0, 1, 1], [], []>} : vector<8x128xf32>, vector<128x128xf32>, vector<8x128xf32> -> vector<8x128xf32>
      %246 = vector.broadcast %19 : vector<1x128xf32> to vector<8x128xf32>
      %247 = arith.addf %245, %246 : vector<8x128xf32>
      %cst_76 = arith.constant dense<0.000000e+00> : vector<8x128xf32>
      %248 = tpu.matmul %241, %15, %cst_76 {dimension_numbers = #tpu.dot_dimension_numbers<[1], [0], [0], [1], [0, 0, 1, 1], [], []>} : vector<8x128xf32>, vector<128x128xf32>, vector<8x128xf32> -> vector<8x128xf32>
      %249 = vector.broadcast %21 : vector<1x128xf32> to vector<8x128xf32>
      %250 = arith.addf %248, %249 : vector<8x128xf32>
      %cst_77 = arith.constant dense<0.000000e+00> : vector<8x128xf32>
      %251 = tpu.matmul %241, %17, %cst_77 {dimension_numbers = #tpu.dot_dimension_numbers<[1], [0], [0], [1], [0, 0, 1, 1], [], []>} : vector<8x128xf32>, vector<128x128xf32>, vector<8x128xf32> -> vector<8x128xf32>
      %252 = vector.broadcast %23 : vector<1x128xf32> to vector<8x128xf32>
      %253 = arith.addf %251, %252 : vector<8x128xf32>
      %254 = vector.extract_strided_slice %244 {offsets = [0, 0, 0], sizes = [1, 8, 128], strides = [1, 1, 1]} : vector<3x8x128xf32> to vector<1x8x128xf32>
      %255 = vector.shape_cast %254 : vector<1x8x128xf32> to vector<8x128xf32>
      %256 = arith.addf %255, %247 : vector<8x128xf32>
      %257 = arith.negf %256 : vector<8x128xf32>
      %258 = math.exp %257 : vector<8x128xf32>
      %cst_78 = arith.constant 1.000000e+00 : f32
      %259 = vector.broadcast %cst_78 : f32 to vector<8x128xf32>
      %260 = arith.addf %259, %258 : vector<8x128xf32>
      %261 = arith.divf %259, %260 : vector<8x128xf32>
      %262 = vector.extract_strided_slice %244 {offsets = [1, 0, 0], sizes = [1, 8, 128], strides = [1, 1, 1]} : vector<3x8x128xf32> to vector<1x8x128xf32>
      %263 = vector.shape_cast %262 : vector<1x8x128xf32> to vector<8x128xf32>
      %264 = arith.addf %263, %250 : vector<8x128xf32>
      %265 = arith.negf %264 : vector<8x128xf32>
      %266 = math.exp %265 : vector<8x128xf32>
      %cst_79 = arith.constant 1.000000e+00 : f32
      %267 = vector.broadcast %cst_79 : f32 to vector<8x128xf32>
      %268 = arith.addf %267, %266 : vector<8x128xf32>
      %269 = arith.divf %267, %268 : vector<8x128xf32>
      %270 = vector.extract_strided_slice %244 {offsets = [2, 0, 0], sizes = [1, 8, 128], strides = [1, 1, 1]} : vector<3x8x128xf32> to vector<1x8x128xf32>
      %271 = vector.shape_cast %270 : vector<1x8x128xf32> to vector<8x128xf32>
      %272 = arith.mulf %261, %253 : vector<8x128xf32>
      %273 = arith.addf %271, %272 : vector<8x128xf32>
      %274 = math.tanh %273 : vector<8x128xf32>
      %cst_80 = arith.constant 1.000000e+00 : f32
      %275 = vector.broadcast %cst_80 : f32 to vector<8x128xf32>
      %276 = arith.subf %275, %269 : vector<8x128xf32>
      %277 = arith.mulf %276, %274 : vector<8x128xf32>
      %278 = arith.mulf %269, %241 : vector<8x128xf32>
      %279 = arith.addf %277, %278 : vector<8x128xf32>
      %280 = arith.addi %0, %c4_i32 : i32
      %281 = vector.broadcast %280 : i32 to vector<8x1xi32>
      %282 = arith.cmpi slt, %281, %11 : vector<8x1xi32>
      %283 = arith.extui %282 : vector<8x1xi1> to vector<8x1xi32>
      %284 = arith.sitofp %283 : vector<8x1xi32> to vector<8x1xf32>
      %285 = vector.broadcast %284 : vector<8x1xf32> to vector<8x128xf32>
      %286 = arith.mulf %285, %279 : vector<8x128xf32>
      %287 = arith.index_cast %c4_i32 : i32 to index
      %c0_81 = arith.constant 0 : index
      %c0_82 = arith.constant 0 : index
      %288 = vector.load %arg7[%287, %c0_81, %c0_82] : memref<8x8x128xf32, #tpu.memory_space<vmem>>, vector<1x8x128xf32>
      %289 = vector.shape_cast %288 : vector<1x8x128xf32> to vector<8x128xf32>
      %290 = vector.shape_cast %286 : vector<8x128xf32> to vector<1x8x128xf32>
      tpu.vector_store %arg7[%287, %c0_81, %c0_82], %290 {strides = array<i32>} : memref<8x8x128xf32, #tpu.memory_space<vmem>>, vector<1x8x128xf32>,
      %cst_83 = arith.constant 1.000000e+00 : f32
      %291 = vector.broadcast %cst_83 : f32 to vector<8x1xf32>
      %292 = arith.subf %291, %284 : vector<8x1xf32>
      %293 = vector.broadcast %292 : vector<8x1xf32> to vector<8x128xf32>
      %294 = arith.mulf %293, %241 : vector<8x128xf32>
      %295 = arith.addf %286, %294 : vector<8x128xf32>
      %c5_i32 = arith.constant 5 : i32
      %296 = arith.index_cast %c5_i32 : i32 to index
      %c0_84 = arith.constant 0 : index
      %c0_85 = arith.constant 0 : index
      %c0_86 = arith.constant 0 : index
      %297 = vector.load %arg3[%296, %c0_84, %c0_85, %c0_86] : memref<8x3x8x128xf32, #tpu.memory_space<vmem>>, vector<1x3x8x128xf32>
      %298 = vector.shape_cast %297 : vector<1x3x8x128xf32> to vector<3x8x128xf32>
      %cst_87 = arith.constant dense<0.000000e+00> : vector<8x128xf32>
      %299 = tpu.matmul %295, %13, %cst_87 {dimension_numbers = #tpu.dot_dimension_numbers<[1], [0], [0], [1], [0, 0, 1, 1], [], []>} : vector<8x128xf32>, vector<128x128xf32>, vector<8x128xf32> -> vector<8x128xf32>
      %300 = vector.broadcast %19 : vector<1x128xf32> to vector<8x128xf32>
      %301 = arith.addf %299, %300 : vector<8x128xf32>
      %cst_88 = arith.constant dense<0.000000e+00> : vector<8x128xf32>
      %302 = tpu.matmul %295, %15, %cst_88 {dimension_numbers = #tpu.dot_dimension_numbers<[1], [0], [0], [1], [0, 0, 1, 1], [], []>} : vector<8x128xf32>, vector<128x128xf32>, vector<8x128xf32> -> vector<8x128xf32>
      %303 = vector.broadcast %21 : vector<1x128xf32> to vector<8x128xf32>
      %304 = arith.addf %302, %303 : vector<8x128xf32>
      %cst_89 = arith.constant dense<0.000000e+00> : vector<8x128xf32>
      %305 = tpu.matmul %295, %17, %cst_89 {dimension_numbers = #tpu.dot_dimension_numbers<[1], [0], [0], [1], [0, 0, 1, 1], [], []>} : vector<8x128xf32>, vector<128x128xf32>, vector<8x128xf32> -> vector<8x128xf32>
      %306 = vector.broadcast %23 : vector<1x128xf32> to vector<8x128xf32>
      %307 = arith.addf %305, %306 : vector<8x128xf32>
      %308 = vector.extract_strided_slice %298 {offsets = [0, 0, 0], sizes = [1, 8, 128], strides = [1, 1, 1]} : vector<3x8x128xf32> to vector<1x8x128xf32>
      %309 = vector.shape_cast %308 : vector<1x8x128xf32> to vector<8x128xf32>
      %310 = arith.addf %309, %301 : vector<8x128xf32>
      %311 = arith.negf %310 : vector<8x128xf32>
      %312 = math.exp %311 : vector<8x128xf32>
      %cst_90 = arith.constant 1.000000e+00 : f32
      %313 = vector.broadcast %cst_90 : f32 to vector<8x128xf32>
      %314 = arith.addf %313, %312 : vector<8x128xf32>
      %315 = arith.divf %313, %314 : vector<8x128xf32>
      %316 = vector.extract_strided_slice %298 {offsets = [1, 0, 0], sizes = [1, 8, 128], strides = [1, 1, 1]} : vector<3x8x128xf32> to vector<1x8x128xf32>
      %317 = vector.shape_cast %316 : vector<1x8x128xf32> to vector<8x128xf32>
      %318 = arith.addf %317, %304 : vector<8x128xf32>
      %319 = arith.negf %318 : vector<8x128xf32>
      %320 = math.exp %319 : vector<8x128xf32>
      %cst_91 = arith.constant 1.000000e+00 : f32
      %321 = vector.broadcast %cst_91 : f32 to vector<8x128xf32>
      %322 = arith.addf %321, %320 : vector<8x128xf32>
      %323 = arith.divf %321, %322 : vector<8x128xf32>
      %324 = vector.extract_strided_slice %298 {offsets = [2, 0, 0], sizes = [1, 8, 128], strides = [1, 1, 1]} : vector<3x8x128xf32> to vector<1x8x128xf32>
      %325 = vector.shape_cast %324 : vector<1x8x128xf32> to vector<8x128xf32>
      %326 = arith.mulf %315, %307 : vector<8x128xf32>
      %327 = arith.addf %325, %326 : vector<8x128xf32>
      %328 = math.tanh %327 : vector<8x128xf32>
      %cst_92 = arith.constant 1.000000e+00 : f32
      %329 = vector.broadcast %cst_92 : f32 to vector<8x128xf32>
      %330 = arith.subf %329, %323 : vector<8x128xf32>
      %331 = arith.mulf %330, %328 : vector<8x128xf32>
      %332 = arith.mulf %323, %295 : vector<8x128xf32>
      %333 = arith.addf %331, %332 : vector<8x128xf32>
      %334 = arith.addi %0, %c5_i32 : i32
      %335 = vector.broadcast %334 : i32 to vector<8x1xi32>
      %336 = arith.cmpi slt, %335, %11 : vector<8x1xi32>
      %337 = arith.extui %336 : vector<8x1xi1> to vector<8x1xi32>
      %338 = arith.sitofp %337 : vector<8x1xi32> to vector<8x1xf32>
      %339 = vector.broadcast %338 : vector<8x1xf32> to vector<8x128xf32>
      %340 = arith.mulf %339, %333 : vector<8x128xf32>
      %341 = arith.index_cast %c5_i32 : i32 to index
      %c0_93 = arith.constant 0 : index
      %c0_94 = arith.constant 0 : index
      %342 = vector.load %arg7[%341, %c0_93, %c0_94] : memref<8x8x128xf32, #tpu.memory_space<vmem>>, vector<1x8x128xf32>
      %343 = vector.shape_cast %342 : vector<1x8x128xf32> to vector<8x128xf32>
      %344 = vector.shape_cast %340 : vector<8x128xf32> to vector<1x8x128xf32>
      tpu.vector_store %arg7[%341, %c0_93, %c0_94], %344 {strides = array<i32>} : memref<8x8x128xf32, #tpu.memory_space<vmem>>, vector<1x8x128xf32>,
      %cst_95 = arith.constant 1.000000e+00 : f32
      %345 = vector.broadcast %cst_95 : f32 to vector<8x1xf32>
      %346 = arith.subf %345, %338 : vector<8x1xf32>
      %347 = vector.broadcast %346 : vector<8x1xf32> to vector<8x128xf32>
      %348 = arith.mulf %347, %295 : vector<8x128xf32>
      %349 = arith.addf %340, %348 : vector<8x128xf32>
      %c6_i32 = arith.constant 6 : i32
      %350 = arith.index_cast %c6_i32 : i32 to index
      %c0_96 = arith.constant 0 : index
      %c0_97 = arith.constant 0 : index
      %c0_98 = arith.constant 0 : index
      %351 = vector.load %arg3[%350, %c0_96, %c0_97, %c0_98] : memref<8x3x8x128xf32, #tpu.memory_space<vmem>>, vector<1x3x8x128xf32>
      %352 = vector.shape_cast %351 : vector<1x3x8x128xf32> to vector<3x8x128xf32>
      %cst_99 = arith.constant dense<0.000000e+00> : vector<8x128xf32>
      %353 = tpu.matmul %349, %13, %cst_99 {dimension_numbers = #tpu.dot_dimension_numbers<[1], [0], [0], [1], [0, 0, 1, 1], [], []>} : vector<8x128xf32>, vector<128x128xf32>, vector<8x128xf32> -> vector<8x128xf32>
      %354 = vector.broadcast %19 : vector<1x128xf32> to vector<8x128xf32>
      %355 = arith.addf %353, %354 : vector<8x128xf32>
      %cst_100 = arith.constant dense<0.000000e+00> : vector<8x128xf32>
      %356 = tpu.matmul %349, %15, %cst_100 {dimension_numbers = #tpu.dot_dimension_numbers<[1], [0], [0], [1], [0, 0, 1, 1], [], []>} : vector<8x128xf32>, vector<128x128xf32>, vector<8x128xf32> -> vector<8x128xf32>
      %357 = vector.broadcast %21 : vector<1x128xf32> to vector<8x128xf32>
      %358 = arith.addf %356, %357 : vector<8x128xf32>
      %cst_101 = arith.constant dense<0.000000e+00> : vector<8x128xf32>
      %359 = tpu.matmul %349, %17, %cst_101 {dimension_numbers = #tpu.dot_dimension_numbers<[1], [0], [0], [1], [0, 0, 1, 1], [], []>} : vector<8x128xf32>, vector<128x128xf32>, vector<8x128xf32> -> vector<8x128xf32>
      %360 = vector.broadcast %23 : vector<1x128xf32> to vector<8x128xf32>
      %361 = arith.addf %359, %360 : vector<8x128xf32>
      %362 = vector.extract_strided_slice %352 {offsets = [0, 0, 0], sizes = [1, 8, 128], strides = [1, 1, 1]} : vector<3x8x128xf32> to vector<1x8x128xf32>
      %363 = vector.shape_cast %362 : vector<1x8x128xf32> to vector<8x128xf32>
      %364 = arith.addf %363, %355 : vector<8x128xf32>
      %365 = arith.negf %364 : vector<8x128xf32>
      %366 = math.exp %365 : vector<8x128xf32>
      %cst_102 = arith.constant 1.000000e+00 : f32
      %367 = vector.broadcast %cst_102 : f32 to vector<8x128xf32>
      %368 = arith.addf %367, %366 : vector<8x128xf32>
      %369 = arith.divf %367, %368 : vector<8x128xf32>
      %370 = vector.extract_strided_slice %352 {offsets = [1, 0, 0], sizes = [1, 8, 128], strides = [1, 1, 1]} : vector<3x8x128xf32> to vector<1x8x128xf32>
      %371 = vector.shape_cast %370 : vector<1x8x128xf32> to vector<8x128xf32>
      %372 = arith.addf %371, %358 : vector<8x128xf32>
      %373 = arith.negf %372 : vector<8x128xf32>
      %374 = math.exp %373 : vector<8x128xf32>
      %cst_103 = arith.constant 1.000000e+00 : f32
      %375 = vector.broadcast %cst_103 : f32 to vector<8x128xf32>
      %376 = arith.addf %375, %374 : vector<8x128xf32>
      %377 = arith.divf %375, %376 : vector<8x128xf32>
      %378 = vector.extract_strided_slice %352 {offsets = [2, 0, 0], sizes = [1, 8, 128], strides = [1, 1, 1]} : vector<3x8x128xf32> to vector<1x8x128xf32>
      %379 = vector.shape_cast %378 : vector<1x8x128xf32> to vector<8x128xf32>
      %380 = arith.mulf %369, %361 : vector<8x128xf32>
      %381 = arith.addf %379, %380 : vector<8x128xf32>
      %382 = math.tanh %381 : vector<8x128xf32>
      %cst_104 = arith.constant 1.000000e+00 : f32
      %383 = vector.broadcast %cst_104 : f32 to vector<8x128xf32>
      %384 = arith.subf %383, %377 : vector<8x128xf32>
      %385 = arith.mulf %384, %382 : vector<8x128xf32>
      %386 = arith.mulf %377, %349 : vector<8x128xf32>
      %387 = arith.addf %385, %386 : vector<8x128xf32>
      %388 = arith.addi %0, %c6_i32 : i32
      %389 = vector.broadcast %388 : i32 to vector<8x1xi32>
      %390 = arith.cmpi slt, %389, %11 : vector<8x1xi32>
      %391 = arith.extui %390 : vector<8x1xi1> to vector<8x1xi32>
      %392 = arith.sitofp %391 : vector<8x1xi32> to vector<8x1xf32>
      %393 = vector.broadcast %392 : vector<8x1xf32> to vector<8x128xf32>
      %394 = arith.mulf %393, %387 : vector<8x128xf32>
      %395 = arith.index_cast %c6_i32 : i32 to index
      %c0_105 = arith.constant 0 : index
      %c0_106 = arith.constant 0 : index
      %396 = vector.load %arg7[%395, %c0_105, %c0_106] : memref<8x8x128xf32, #tpu.memory_space<vmem>>, vector<1x8x128xf32>
      %397 = vector.shape_cast %396 : vector<1x8x128xf32> to vector<8x128xf32>
      %398 = vector.shape_cast %394 : vector<8x128xf32> to vector<1x8x128xf32>
      tpu.vector_store %arg7[%395, %c0_105, %c0_106], %398 {strides = array<i32>} : memref<8x8x128xf32, #tpu.memory_space<vmem>>, vector<1x8x128xf32>,
      %cst_107 = arith.constant 1.000000e+00 : f32
      %399 = vector.broadcast %cst_107 : f32 to vector<8x1xf32>
      %400 = arith.subf %399, %392 : vector<8x1xf32>
      %401 = vector.broadcast %400 : vector<8x1xf32> to vector<8x128xf32>
      %402 = arith.mulf %401, %349 : vector<8x128xf32>
      %403 = arith.addf %394, %402 : vector<8x128xf32>
      %c7_i32 = arith.constant 7 : i32
      %404 = arith.index_cast %c7_i32 : i32 to index
      %c0_108 = arith.constant 0 : index
      %c0_109 = arith.constant 0 : index
      %c0_110 = arith.constant 0 : index
      %405 = vector.load %arg3[%404, %c0_108, %c0_109, %c0_110] : memref<8x3x8x128xf32, #tpu.memory_space<vmem>>, vector<1x3x8x128xf32>
      %406 = vector.shape_cast %405 : vector<1x3x8x128xf32> to vector<3x8x128xf32>
      %cst_111 = arith.constant dense<0.000000e+00> : vector<8x128xf32>
      %407 = tpu.matmul %403, %13, %cst_111 {dimension_numbers = #tpu.dot_dimension_numbers<[1], [0], [0], [1], [0, 0, 1, 1], [], []>} : vector<8x128xf32>, vector<128x128xf32>, vector<8x128xf32> -> vector<8x128xf32>
      %408 = vector.broadcast %19 : vector<1x128xf32> to vector<8x128xf32>
      %409 = arith.addf %407, %408 : vector<8x128xf32>
      %cst_112 = arith.constant dense<0.000000e+00> : vector<8x128xf32>
      %410 = tpu.matmul %403, %15, %cst_112 {dimension_numbers = #tpu.dot_dimension_numbers<[1], [0], [0], [1], [0, 0, 1, 1], [], []>} : vector<8x128xf32>, vector<128x128xf32>, vector<8x128xf32> -> vector<8x128xf32>
      %411 = vector.broadcast %21 : vector<1x128xf32> to vector<8x128xf32>
      %412 = arith.addf %410, %411 : vector<8x128xf32>
      %cst_113 = arith.constant dense<0.000000e+00> : vector<8x128xf32>
      %413 = tpu.matmul %403, %17, %cst_113 {dimension_numbers = #tpu.dot_dimension_numbers<[1], [0], [0], [1], [0, 0, 1, 1], [], []>} : vector<8x128xf32>, vector<128x128xf32>, vector<8x128xf32> -> vector<8x128xf32>
      %414 = vector.broadcast %23 : vector<1x128xf32> to vector<8x128xf32>
      %415 = arith.addf %413, %414 : vector<8x128xf32>
      %416 = vector.extract_strided_slice %406 {offsets = [0, 0, 0], sizes = [1, 8, 128], strides = [1, 1, 1]} : vector<3x8x128xf32> to vector<1x8x128xf32>
      %417 = vector.shape_cast %416 : vector<1x8x128xf32> to vector<8x128xf32>
      %418 = arith.addf %417, %409 : vector<8x128xf32>
      %419 = arith.negf %418 : vector<8x128xf32>
      %420 = math.exp %419 : vector<8x128xf32>
      %cst_114 = arith.constant 1.000000e+00 : f32
      %421 = vector.broadcast %cst_114 : f32 to vector<8x128xf32>
      %422 = arith.addf %421, %420 : vector<8x128xf32>
      %423 = arith.divf %421, %422 : vector<8x128xf32>
      %424 = vector.extract_strided_slice %406 {offsets = [1, 0, 0], sizes = [1, 8, 128], strides = [1, 1, 1]} : vector<3x8x128xf32> to vector<1x8x128xf32>
      %425 = vector.shape_cast %424 : vector<1x8x128xf32> to vector<8x128xf32>
      %426 = arith.addf %425, %412 : vector<8x128xf32>
      %427 = arith.negf %426 : vector<8x128xf32>
      %428 = math.exp %427 : vector<8x128xf32>
      %cst_115 = arith.constant 1.000000e+00 : f32
      %429 = vector.broadcast %cst_115 : f32 to vector<8x128xf32>
      %430 = arith.addf %429, %428 : vector<8x128xf32>
      %431 = arith.divf %429, %430 : vector<8x128xf32>
      %432 = vector.extract_strided_slice %406 {offsets = [2, 0, 0], sizes = [1, 8, 128], strides = [1, 1, 1]} : vector<3x8x128xf32> to vector<1x8x128xf32>
      %433 = vector.shape_cast %432 : vector<1x8x128xf32> to vector<8x128xf32>
      %434 = arith.mulf %423, %415 : vector<8x128xf32>
      %435 = arith.addf %433, %434 : vector<8x128xf32>
      %436 = math.tanh %435 : vector<8x128xf32>
      %cst_116 = arith.constant 1.000000e+00 : f32
      %437 = vector.broadcast %cst_116 : f32 to vector<8x128xf32>
      %438 = arith.subf %437, %431 : vector<8x128xf32>
      %439 = arith.mulf %438, %436 : vector<8x128xf32>
      %440 = arith.mulf %431, %403 : vector<8x128xf32>
      %441 = arith.addf %439, %440 : vector<8x128xf32>
      %442 = arith.addi %0, %c7_i32 : i32
      %443 = vector.broadcast %442 : i32 to vector<8x1xi32>
      %444 = arith.cmpi slt, %443, %11 : vector<8x1xi32>
      %445 = arith.extui %444 : vector<8x1xi1> to vector<8x1xi32>
      %446 = arith.sitofp %445 : vector<8x1xi32> to vector<8x1xf32>
      %447 = vector.broadcast %446 : vector<8x1xf32> to vector<8x128xf32>
      %448 = arith.mulf %447, %441 : vector<8x128xf32>
      %449 = arith.index_cast %c7_i32 : i32 to index
      %c0_117 = arith.constant 0 : index
      %c0_118 = arith.constant 0 : index
      %450 = vector.load %arg7[%449, %c0_117, %c0_118] : memref<8x8x128xf32, #tpu.memory_space<vmem>>, vector<1x8x128xf32>
      %451 = vector.shape_cast %450 : vector<1x8x128xf32> to vector<8x128xf32>
      %452 = vector.shape_cast %448 : vector<8x128xf32> to vector<1x8x128xf32>
      tpu.vector_store %arg7[%449, %c0_117, %c0_118], %452 {strides = array<i32>} : memref<8x8x128xf32, #tpu.memory_space<vmem>>, vector<1x8x128xf32>,
      %cst_119 = arith.constant 1.000000e+00 : f32
      %453 = vector.broadcast %cst_119 : f32 to vector<8x1xf32>
      %454 = arith.subf %453, %446 : vector<8x1xf32>
      %455 = vector.broadcast %454 : vector<8x1xf32> to vector<8x128xf32>
      %456 = arith.mulf %455, %403 : vector<8x128xf32>
      %457 = arith.addf %448, %456 : vector<8x128xf32>
      %c8_i32_120 = arith.constant 8 : i32
      %c0_121 = arith.constant 0 : index
      %c0_122 = arith.constant 0 : index
      %c0_123 = arith.constant 0 : index
      %458 = vector.load %arg8[%c0_121, %c0_122, %c0_123] : memref<1x8x128xf32, #tpu.memory_space<vmem>>, vector<1x8x128xf32>
      %459 = vector.shape_cast %458 : vector<1x8x128xf32> to vector<8x128xf32>
      %460 = vector.shape_cast %457 : vector<8x128xf32> to vector<1x8x128xf32>
      tpu.vector_store %arg8[%c0_121, %c0_122, %c0_123], %460 {strides = array<i32>} : memref<1x8x128xf32, #tpu.memory_space<vmem>>, vector<1x8x128xf32>,
    } else {
    }
    return
  }
  func.func @transform_0(%arg0: i32, %arg1: i32, %arg2: memref<1xi32, #tpu.memory_space<smem>>) -> (i32, i32, i32, i32) {
    %c0_i32 = arith.constant 0 : i32
    %c0_i32_0 = arith.constant 0 : i32
    %c0_i32_1 = arith.constant 0 : i32
    return %arg1, %c0_i32, %arg0, %c0_i32_0 : i32, i32, i32, i32
  }
  func.func @transform_1(%arg0: i32, %arg1: i32, %arg2: memref<1xi32, #tpu.memory_space<smem>>) -> (i32, i32) {
    %c0_i32 = arith.constant 0 : i32
    %c0_i32_0 = arith.constant 0 : i32
    return %arg0, %c0_i32 : i32, i32
  }
  func.func @transform_2(%arg0: i32, %arg1: i32, %arg2: memref<1xi32, #tpu.memory_space<smem>>) -> (i32, i32, i32) {
    %c0_i32 = arith.constant 0 : i32
    %c0_i32_0 = arith.constant 0 : i32
    %c0_i32_1 = arith.constant 0 : i32
    %c0_i32_2 = arith.constant 0 : i32
    return %c0_i32, %c0_i32_0, %c0_i32_1 : i32, i32, i32
  }
  func.func @transform_3(%arg0: i32, %arg1: i32, %arg2: memref<1xi32, #tpu.memory_space<smem>>) -> (i32, i32, i32) {
    %c0_i32 = arith.constant 0 : i32
    %c0_i32_0 = arith.constant 0 : i32
    %c0_i32_1 = arith.constant 0 : i32
    %c0_i32_2 = arith.constant 0 : i32
    return %c0_i32, %c0_i32_0, %c0_i32_1 : i32, i32, i32
  }
  func.func @transform_4(%arg0: i32, %arg1: i32, %arg2: memref<1xi32, #tpu.memory_space<smem>>) -> (i32, i32, i32) {
    %c0_i32 = arith.constant 0 : i32
    %c0_i32_0 = arith.constant 0 : i32
    return %arg1, %arg0, %c0_i32 : i32, i32, i32
  }
  func.func @transform_5(%arg0: i32, %arg1: i32, %arg2: memref<1xi32, #tpu.memory_space<smem>>) -> (i32, i32, i32) {
    %c0_i32 = arith.constant 0 : i32
    %c0_i32_0 = arith.constant 0 : i32
    %c0_i32_1 = arith.constant 0 : i32
    return %c0_i32, %arg0, %c0_i32_0 : i32, i32, i32
  }
}

</mosaic_0001>

<bundles_post_ra>
// kernel: tpu_custom_call.1
= control target key start
LH: loop header
LB: loop body
LE: loop exit
PB: predicated region body
PF: predicated region fallthrough
CT: control target
= control target key end

     0   :  { %13 = vsyncpa [#allocation5], 0  ;;  %s2314_s0 = inlined_call_operand.<no memory space> [shape: s32[1], index: 0, kind: input, shape index: {}]   ;;  %s2315_s1 = inlined_call_operand.hbm [shape: f32[8,3,8,128], index: 1, kind: input, shape index: {}]   ;;  %s2316_s2 = inlined_call_operand.vmem [shape: s32[8,1], index: 2, kind: input, shape index: {}]   ;;  %s2317_s3 = inlined_call_operand.hbm [shape: f32[3,128,128], index: 3, kind: input, shape index: {}]   ;;  %s2318_s4 = inlined_call_operand.vmem [shape: f32[3,1,128], index: 4, kind: input, shape index: {}]   ;;  %s2319_s5 = inlined_call_operand.hbm [shape: f32[8,8,128], index: 5, kind: output, shape index: {0}]   ;;  %s2320_s6 = inlined_call_operand.hbm [shape: f32[1,8,128], index: 6, kind: output, shape index: {1}]  }
   0x1   :  { %14 = vsyncpa [#allocation8], 0 }
   0x2   :  { %15 = vsyncpa [#allocation6], 0 }
   0x3   :  { %16 = vsyncpa [#allocation11], 0  ;;  %s21_s23 = sshll.u32 %s2315_s1, 4  ;;  %s1523_s24 = smov [#allocation4]   ;;  %s22_s23 = int_to_ptr.hbm [resolvable:$true] %s21_s23 }
   0x4   :  { %s23_s25 = sshll.u32 %s1523_s24, 4  ;;  %s36_s28 = sshll.u32 %s2317_s3, 4  ;;  %s24_s25 = int_to_ptr.vmem [resolvable:$true] %s23_s25  ;;  %s37_s28 = int_to_ptr.hbm [resolvable:$true] %s36_s28 }
   0x5   :  { %s1524_s29 = smov 128   ;;  %s1525_s30 = smov 8  }
   0x6   :  { %29 = dma.hbm_to_vmem [thread:$0]  %s22_s23, 3072, %s24_s25, [#allocation5], %s1524_s29, %s1524_s29, %s1525_s30  }
   0x7   :  { %s1526_s7 = smov [#allocation7]  }
   0x8   :  { %s38_s8 = sshll.u32 %s1526_s7, 4  ;;  %s39_s8 = int_to_ptr.vmem [resolvable:$true] %s38_s8 }
   0x9   :  { %44 = dma.hbm_to_vmem [thread:$0]  %s37_s28, 6144, %s39_s8, [#allocation8], %s1524_s29, %s1524_s29, %s1525_s30  }
   0xa   :  { %1515 = dma.done.wait [#allocation5], 3072  }
   0xb   :  { %1516 = vsyncadd [#allocation5], 4294964224 }
   0xc   :  { %1517 = dma.done.wait [#allocation8], 6144  }
   0xd   :  { %1518 = vsyncadd [#allocation8], 4294961152  ;;  %v1527_v0 = vmov 0.0   ;;  %p1235_p0 = scmp.gt.s32.totalorder %s2314_s0, 0 }
   0xe   :  { %60 = vst [vmem:[#allocation10] sm:$0xff] %v1527_v0 }
   0xf   :  { %65 = sbr.rel (%p1235_p0) target bundleno = 29 (0x1d), region = 33 }
  0x14   :  { %v1528_v1 = vmov 0.0  }
  0x15   :  { %66 = vst [vmem:[#allocation9] sm:$0xff] %v1528_v1 }
  0x16   :  { %67 = vst [vmem:[#allocation9 + $0x8] sm:$0xff] %v1528_v1 }
  0x17   :  { %68 = vst [vmem:[#allocation9 + $0x10] sm:$0xff] %v1528_v1 }
  0x18   :  { %69 = vst [vmem:[#allocation9 + $0x18] sm:$0xff] %v1528_v1 }
  0x19   :  { %70 = vst [vmem:[#allocation9 + $0x20] sm:$0xff] %v1528_v1 }
  0x1a   :  { %71 = vst [vmem:[#allocation9 + $0x28] sm:$0xff] %v1528_v1 }
  0x1b   :  { %72 = vst [vmem:[#allocation9 + $0x30] sm:$0xff] %v1528_v1 }
  0x1c   :  { %73 = vst [vmem:[#allocation9 + $0x38] sm:$0xff] %v1528_v1 }
  0x1d PF:  { %p1237_p1 = scmp.le.s32.totalorder %s2314_s0, 0 }
  0x1f   :  { %77 = sbr.rel (%p1237_p1) target bundleno = 1509 (0x5e5), region = 37 }
  0x24   :  { %v1586_v2 = vld [vmem:[#allocation7 + $0x78] sm:$0xff]  ;;  %v1590_v4 = vld [vmem:[#allocation7 + $0x70] sm:$0xff]  ;;  %v1596_v6 = vld [vmem:[#allocation7 + $0x68] sm:$0xff]  ;;  %v1529_v8 = vmov 0   ;;  %v2321_v29 = vmov 0.0  }
  0x25   :  { %v1588_v3 = vld [vmem:[#allocation7 + $0xf8] sm:$0xff]  ;;  %141 = vmatpush.msra.mxu0 %v1586_v2  ;;  %v1594_v5 = vld [vmem:[#allocation7 + $0xf0] sm:$0xff]  ;;  %v1598_v7 = vld [vmem:[#allocation7 + $0xe8] sm:$0xff]  ;;  %1282 = vset.pattern.permute.xlu0 %v1529_v8 }
  0x26   :  { %164 = vmatpush.msra.mxu1 %v1588_v3  ;;  %1283 = vset.pattern.permute.xlu1 %v1529_v8  ;;  %v1602_v9 = vld [vmem:[#allocation7 + $0x60] sm:$0xff]  ;;  %v1609_v11 = vld [vmem:[#allocation7 + $0x58] sm:$0xff]  ;;  %v1616_v13 = vld [vmem:[#allocation7 + $0x50] sm:$0xff] }
  0x27   :  { %142 = vmatpush.msra.mxu0 %v1590_v4  ;;  %v1604_v10 = vld [vmem:[#allocation7 + $0xe0] sm:$0xff]  ;;  %277 = vmatpush.msra.mxu3 %v1586_v2  ;;  %v1611_v12 = vld [vmem:[#allocation7 + $0xd8] sm:$0xff]  ;;  %v1618_v14 = vld [vmem:[#allocation7 + $0xd0] sm:$0xff] }
  0x28   :  { %165 = vmatpush.msra.mxu1 %v1594_v5  ;;  %1284 = vset.pattern.permute.xlu2 %v1529_v8  ;;  %v1620_v15 = vld [vmem:[#allocation7 + $0x178] sm:$0xff]  ;;  %v1625_v16 = vld [vmem:[#allocation7 + $0x170] sm:$0xff]  ;;  %v1627_v17 = vld [vmem:[#allocation7 + $0x48] sm:$0xff] }
  0x29   :  { %143 = vmatpush.msra.mxu0 %v1596_v6  ;;  %278 = vmatpush.msra.mxu3 %v1590_v4  ;;  %v1629_v18 = vld [vmem:[#allocation7 + $0xc8] sm:$0xff]  ;;  %v1637_v20 = vld [vmem:[#allocation7 + $0x40] sm:$0xff]  ;;  %v1647_v23 = vld [vmem:[#allocation7 + $0x38] sm:$0xff] }
  0x2a   :  { %166 = vmatpush.msra.mxu1 %v1598_v7  ;;  %187 = vmatpush.msra.mxu2 %v1620_v15  ;;  %v1635_v19 = vld [vmem:[#allocation7 + $0x168] sm:$0xff]  ;;  %v1639_v21 = vld [vmem:[#allocation7 + $0xc0] sm:$0xff]  ;;  %v1649_v24 = vld [vmem:[#allocation7 + $0xb8] sm:$0xff] }
  0x2b   :  { %144 = vmatpush.msra.mxu0 %v1602_v9  ;;  %279 = vmatpush.msra.mxu3 %v1596_v6  ;;  %v1645_v22 = vld [vmem:[#allocation7 + $0x160] sm:$0xff]  ;;  %v1660_v26 = vld [vmem:[#allocation7 + $0x158] sm:$0xff]  ;;  %v1663_v27 = vld [vmem:[#allocation7 + $0x30] sm:$0xff] }
  0x2c   :  { %167 = vmatpush.msra.mxu1 %v1604_v10  ;;  %188 = vmatpush.msra.mxu2 %v1625_v16  ;;  %v1655_v25 = vld [vmem:[%s2316_s2] sm:$0xff]  ;;  %v1665_v28 = vld [vmem:[#allocation7 + $0xb0] sm:$0xff]  ;;  %v1672_v31 = vld [vmem:[#allocation7 + $0x28] sm:$0xff] }
  0x2d   :  { %145 = vmatpush.msra.mxu0 %v1609_v11  ;;  %280 = vmatpush.msra.mxu3 %v1602_v9  ;;  %vm1242_vm0 = vcmp.gt.s32.totalorder %v1655_v25, 0  ;;  %v1674_v32 = vld [vmem:[#allocation7 + $0x150] sm:$0xff]  ;;  %v1676_v33 = vld [vmem:[#allocation7 + $0xa8] sm:$0xff]  ;;  %v1683_v35 = vld [vmem:[#allocation7 + $0x20] sm:$0xff]  ;;  %vm1246_vm1 = vcmp.gt.s32.totalorder %v1655_v25, 1  ;;  %vm1254_vm2 = vcmp.gt.s32.totalorder %v1655_v25, 3 }
  0x2e   :  { %168 = vmatpush.msra.mxu1 %v1611_v12  ;;  %189 = vmatpush.msra.mxu2 %v1635_v19  ;;  %v1243_v30 = vsel %vm1242_vm0, 1.0, %v2321_v29  ;;  %v1681_v34 = vld [vmem:[#allocation7 + $0x148] sm:$0xff]  ;;  %v1685_v36 = vld [vmem:[#allocation7 + $0xa0] sm:$0xff]  ;;  %v1693_v38 = vld [vmem:[#allocation7 + $0x18] sm:$0xff]  ;;  %v1247_v48 = vsel %vm1246_vm1, 1.0, %v2321_v29  ;;  %v1255_v53 = vsel %vm1254_vm2, 1.0, %v2321_v29 }
  0x2f   :  { %146 = vmatpush.msra.mxu0 %v1616_v13  ;;  %281 = vmatpush.msra.mxu3 %v1609_v11  ;;  %v1691_v37 = vld [vmem:[#allocation7 + $0x140] sm:$0xff]  ;;  %2353 = vst [vmem:[#allocation16_spill] sm:$0xff] %v1693_v38  ;;  %v1695_v39 = vld [vmem:[#allocation7 + $0x98] sm:$0xff]  ;;  %v265_v40 = vsub.f32 1.0, %v1243_v30  ;;  %v1703_v42 = vld [vmem:[#allocation7 + $0x10] sm:$0xff]  ;;  %vm1258_vm3 = vcmp.gt.s32.totalorder %v1655_v25, 4 }
  0x30   :  { %169 = vmatpush.msra.mxu1 %v1618_v14  ;;  %190 = vmatpush.msra.mxu2 %v1645_v22  ;;  %2354 = vst [vmem:[#allocation17_spill] sm:$0xff] %v1695_v39  ;;  %v1701_v41 = vld [vmem:[#allocation7 + $0x138] sm:$0xff]  ;;  %v1705_v43 = vld [vmem:[#allocation7 + $0x90] sm:$0xff]  ;;  %v1713_v45 = vld [vmem:[#allocation7 + $0x8] sm:$0xff]  ;;  %v397_v55 = vsub.f32 1.0, %v1247_v48  ;;  %v1753_v57 = vsel %vm1258_vm3, 1.0, %v2321_v29 }
  0x31   :  { %147 = vmatpush.msra.mxu0 %v1627_v17  ;;  %282 = vmatpush.msra.mxu3 %v1616_v13  ;;  %2355 = vst [vmem:[#allocation18_spill] sm:$0xff] %v1703_v42  ;;  %v1711_v44 = vld [vmem:[#allocation7 + $0x130] sm:$0xff]  ;;  %v1715_v46 = vld [vmem:[#allocation7 + $0x88] sm:$0xff]  ;;  %v1724_v49 = vld [vmem:[#allocation7] sm:$0xff]  ;;  %v793_v60 = vsub.f32 1.0, %v1753_v57  ;;  %v661_v61 = vsub.f32 1.0, %v1255_v53 }
  0x32   :  { %170 = vmatpush.msra.mxu1 %v1629_v18  ;;  %191 = vmatpush.msra.mxu2 %v1660_v26  ;;  %2356 = vst [vmem:[#allocation19_spill] sm:$0xff] %v1705_v43  ;;  %v1721_v47 = vld [vmem:[#allocation7 + $0x128] sm:$0xff]  ;;  %v1726_v50 = vld [vmem:[#allocation7 + $0x80] sm:$0xff]  ;;  %v1743_v54 = vld [vmem:[#allocation7 + $0x118] sm:$0xff]  ;;  %vm1266_vm4 = vcmp.gt.s32.totalorder %v1655_v25, 6  ;;  %vm1270_vm5 = vcmp.gt.s32.totalorder %v1655_v25, 7 }
  0x33   :  { %148 = vmatpush.msra.mxu0 %v1637_v20  ;;  %283 = vmatpush.msra.mxu3 %v1627_v17  ;;  %2357 = vst [vmem:[#allocation20_spill] sm:$0xff] %v1713_v45  ;;  %v1732_v51 = vld [vmem:[#allocation10] sm:$0xff]  ;;  %v1748_v56 = vld [vmem:[#allocation7 + $0x110] sm:$0xff]  ;;  %v1756_v58 = vld [vmem:[#allocation7 + $0x108] sm:$0xff]  ;;  %v1782_v62 = vsel %vm1266_vm4, 1.0, %v2321_v29  ;;  %v1794_v63 = vsel %vm1270_vm5, 1.0, %v2321_v29 }
  0x34   :  { %171 = vmatpush.msra.mxu1 %v1639_v21  ;;  %260 = vperm.xlu0 %1282, %v1243_v30   ;;  %2358 = vst [vmem:[#allocation21_spill] sm:$0xff] %v1715_v46  ;;  %v1735_v52 = vld [vmem:[#allocation7 + $0x120] sm:$0xff]  ;;  %v1189_v0 = vsub.f32 1.0, %v1794_v63  ;;  %vm1262_vm6 = vcmp.gt.s32.totalorder %v1655_v25, 5  ;;  %vm1250_vm7 = vcmp.gt.s32.totalorder %v1655_v25, 2 }
  0x35   :  { %149 = vmatpush.msra.mxu0 %v1647_v23  ;;  %192 = vmatpush.msra.mxu2 %v1674_v32  ;;  %2359 = vst [vmem:[#allocation22_spill] sm:$0xff] %v1724_v49  ;;  %v1761_v59 = vld [vmem:[#allocation7 + $0x100] sm:$0xff] }
  0x36   :  { %172 = vmatpush.msra.mxu1 %v1649_v24  ;;  %284 = vmatpush.msra.mxu3 %v1637_v20  ;;  %2360 = vst [vmem:[#allocation23_spill] sm:$0xff] %v1726_v50  ;;  %v1892_v1 = vld [vmem:[%s2318_s4] ss:$0 sm:$0xff]  ;;  %v1897_v8 = vld [vmem:[%s2318_s4 + $0x1] ss:$0 sm:$0xff] }
  0x37   :  { %150 = vmatpush.msra.mxu0 %v1663_v27  ;;  %193 = vmatpush.msra.mxu2 %v1681_v34  ;;  %2361 = vst [vmem:[#allocation24_spill] sm:$0xff] %v1743_v54  ;;  %v135_v30 = vld [vmem:[#allocation4] sm:$0xff] }
  0x38   :  { %173 = vmatpush.msra.mxu1 %v1665_v28  ;;  %285 = vmatpush.msra.mxu3 %v1647_v23  ;;  %2362 = vst [vmem:[#allocation25_spill] sm:$0xff] %v1748_v56 }
  0x39   :  { %151 = vmatpush.msra.mxu0 %v1672_v31  ;;  %194 = vmatpush.msra.mxu2 %v1691_v37  ;;  %2363 = vst [vmem:[#allocation26_spill] sm:$0xff] %v1756_v58 }
  0x3a   :  { %174 = vmatpush.msra.mxu1 %v1676_v33  ;;  %286 = vmatpush.msra.mxu3 %v1663_v27  ;;  %2364 = vst [vmem:[#allocation27_spill] sm:$0xff] %v1761_v59 }
  0x3b   :  { %152 = vmatpush.msra.mxu0 %v1683_v35  ;;  %195 = vmatpush.msra.mxu2 %v1701_v41  ;;  %2365 = vst [vmem:[#allocation28_spill] sm:$0xff] %v1892_v1 }
  0x3c   :  { %175 = vmatpush.msra.mxu1 %v1685_v36  ;;  %268 = vperm.xlu0 %1282, %v265_v40   ;;  %2366 = vst [vmem:[#allocation29_spill] sm:$0xff] %v1897_v8 }
  0x3d   :  { %153 = vmatpush.msra.mxu0 %v1693_v38  ;;  %196 = vmatpush.msra.mxu2 %v1711_v44 }
  0x3e   :  { %176 = vmatpush.msra.mxu1 %v1695_v39  ;;  %391 = vperm.xlu1 %1283, %v1247_v48   ;;  %v136_v48 = vld [vmem:[#allocation4 + $0x8] sm:$0xff] }
  0x3f   :  { %154 = vmatpush.msra.mxu0 %v1703_v42  ;;  %197 = vmatpush.msra.mxu2 %v1721_v47 }
  0x40   :  { %177 = vmatpush.msra.mxu1 %v1705_v43  ;;  %287 = vmatpush.msra.mxu3 %v1672_v31 }
  0x41   :  { %155 = vmatpush.msra.mxu0 %v1713_v45  ;;  %198 = vmatpush.msra.mxu2 %v1735_v52 }
  0x42   :  { %178 = vmatpush.msra.mxu1 %v1715_v46  ;;  %288 = vmatpush.msra.mxu3 %v1683_v35 }
  0x43   :  { %156 = vmatpush.msra.mxu0 %v1724_v49  ;;  %199 = vmatpush.msra.mxu2 %v1743_v54 }
  0x44   :  { %179 = vmatpush.msra.mxu1 %v1726_v50  ;;  %157 = vmatmul.f32.vlgmr.msra.gmra.mxu0 %v1732_v51 }
  0x45   :  { %180 = vmatmul.f32.vlgmr.msra.gmra.mxu1 %v1732_v51  ;;  %297 = vmatpush.msrb.mxu0 %v1588_v3 }
  0x46   :  { %655 = vperm.xlu0 %1282, %v1255_v53   ;;  %317 = vmatpush.msrb.mxu1 %v1620_v15 }
  0x47   :  { %298 = vmatpush.msrb.mxu0 %v1594_v5  ;;  %400 = vperm.xlu1 %1283, %v397_v55  }
  0x48   :  { %318 = vmatpush.msrb.mxu1 %v1625_v16  ;;  %200 = vmatpush.msra.mxu2 %v1748_v56 }
  0x49   :  { %299 = vmatpush.msrb.mxu0 %v1598_v7  ;;  %289 = vmatpush.msra.mxu3 %v1693_v38 }
  0x4a   :  { %319 = vmatpush.msrb.mxu1 %v1635_v19  ;;  %201 = vmatpush.msra.mxu2 %v1756_v58 }
  0x4b   :  { %300 = vmatpush.msrb.mxu0 %v1604_v10  ;;  %290 = vmatpush.msra.mxu3 %v1703_v42 }
  0x4c   :  { %320 = vmatpush.msrb.mxu1 %v1645_v22  ;;  %202 = vmatpush.msra.mxu2 %v1761_v59 }
  0x4d   :  { %301 = vmatpush.msrb.mxu0 %v1611_v12  ;;  %203 = vmatmul.f32.vlgmr.msra.gmra.mxu2 %v1732_v51 }
  0x4e   :  { %796 = vperm.xlu0 %1282, %v793_v60   ;;  %321 = vmatpush.msrb.mxu1 %v1660_v26 }
  0x4f   :  { %302 = vmatpush.msrb.mxu0 %v1618_v14  ;;  %664 = vperm.xlu1 %1283, %v661_v61  }
  0x50   :  { %322 = vmatpush.msrb.mxu1 %v1674_v32  ;;  %291 = vmatpush.msra.mxu3 %v1713_v45 }
  0x51   :  { %303 = vmatpush.msrb.mxu0 %v1629_v18  ;;  %409 = vmatpush.msrb.mxu2 %v1586_v2 }
  0x52   :  { %323 = vmatpush.msrb.mxu1 %v1681_v34  ;;  %292 = vmatpush.msra.mxu3 %v1724_v49 }
  0x53   :  { %304 = vmatpush.msrb.mxu0 %v1639_v21  ;;  %410 = vmatpush.msrb.mxu2 %v1590_v4 }
  0x54   :  { %324 = vmatpush.msrb.mxu1 %v1691_v37  ;;  %429 = vmatpush.msrb.mxu3 %v1588_v3 }
  0x55   :  { %305 = vmatpush.msrb.mxu0 %v1649_v24  ;;  %411 = vmatpush.msrb.mxu2 %v1596_v6 }
  0x56   :  { %1051 = vperm.xlu0 %1282, %v1782_v62   ;;  %325 = vmatpush.msrb.mxu1 %v1701_v41 }
  0x57   :  { %306 = vmatpush.msrb.mxu0 %v1665_v28  ;;  %430 = vmatpush.msrb.mxu3 %v1594_v5 }
  0x58   :  { %326 = vmatpush.msrb.mxu1 %v1711_v44  ;;  %412 = vmatpush.msrb.mxu2 %v1602_v9 }
  0x59   :  { %307 = vmatpush.msrb.mxu0 %v1676_v33  ;;  %431 = vmatpush.msrb.mxu3 %v1598_v7 }
  0x5a   :  { %327 = vmatpush.msrb.mxu1 %v1721_v47  ;;  %413 = vmatpush.msrb.mxu2 %v1609_v11 }
  0x5b   :  { %308 = vmatpush.msrb.mxu0 %v1685_v36  ;;  %432 = vmatpush.msrb.mxu3 %v1604_v10 }
  0x5c   :  { %328 = vmatpush.msrb.mxu1 %v1735_v52  ;;  %414 = vmatpush.msrb.mxu2 %v1616_v13 }
  0x5d   :  { %309 = vmatpush.msrb.mxu0 %v1695_v39  ;;  %433 = vmatpush.msrb.mxu3 %v1611_v12 }
  0x5e   :  { %1192 = vperm.xlu0 %1282, %v1189_v0   ;;  %329 = vmatpush.msrb.mxu1 %v1743_v54 }
  0x5f   :  { %310 = vmatpush.msrb.mxu0 %v1705_v43  ;;  %434 = vmatpush.msrb.mxu3 %v1618_v14 }
  0x60   :  { %330 = vmatpush.msrb.mxu1 %v1748_v56  ;;  %415 = vmatpush.msrb.mxu2 %v1627_v17 }
  0x61   :  { %311 = vmatpush.msrb.mxu0 %v1715_v46  ;;  %435 = vmatpush.msrb.mxu3 %v1629_v18 }
  0x62   :  { %331 = vmatpush.msrb.mxu1 %v1756_v58  ;;  %416 = vmatpush.msrb.mxu2 %v1637_v20 }
  0x63   :  { %312 = vmatpush.msrb.mxu0 %v1726_v50  ;;  %436 = vmatpush.msrb.mxu3 %v1639_v21 }
  0x64   :  { %332 = vmatpush.msrb.mxu1 %v1761_v59  ;;  %417 = vmatpush.msrb.mxu2 %v1647_v23 }
  0x65   :  { %449 = vmatpush.msra.mxu0 %v1620_v15  ;;  %437 = vmatpush.msrb.mxu3 %v1649_v24 }
  0x66   :  { %541 = vmatpush.msra.mxu1 %v1586_v2  ;;  %418 = vmatpush.msrb.mxu2 %v1663_v27 }
  0x67   :  { %450 = vmatpush.msra.mxu0 %v1625_v16  ;;  %438 = vmatpush.msrb.mxu3 %v1665_v28 }
  0x68   :  { %542 = vmatpush.msra.mxu1 %v1590_v4  ;;  %419 = vmatpush.msrb.mxu2 %v1672_v31 }
  0x69   :  { %451 = vmatpush.msra.mxu0 %v1635_v19  ;;  %439 = vmatpush.msrb.mxu3 %v1676_v33 }
  0x6a   :  { %543 = vmatpush.msra.mxu1 %v1596_v6  ;;  %420 = vmatpush.msrb.mxu2 %v1683_v35 }
  0x6b   :  { %452 = vmatpush.msra.mxu0 %v1645_v22  ;;  %440 = vmatpush.msrb.mxu3 %v1685_v36 }
  0x6c   :  { %544 = vmatpush.msra.mxu1 %v1602_v9  ;;  %421 = vmatpush.msrb.mxu2 %v1693_v38 }
  0x6d   :  { %453 = vmatpush.msra.mxu0 %v1660_v26  ;;  %441 = vmatpush.msrb.mxu3 %v1695_v39 }
  0x6e   :  { %545 = vmatpush.msra.mxu1 %v1609_v11  ;;  %422 = vmatpush.msrb.mxu2 %v1703_v42 }
  0x6f   :  { %454 = vmatpush.msra.mxu0 %v1674_v32  ;;  %442 = vmatpush.msrb.mxu3 %v1705_v43 }
  0x70   :  { %546 = vmatpush.msra.mxu1 %v1616_v13  ;;  %423 = vmatpush.msrb.mxu2 %v1713_v45 }
  0x71   :  { %455 = vmatpush.msra.mxu0 %v1681_v34  ;;  %443 = vmatpush.msrb.mxu3 %v1715_v46 }
  0x72   :  { %547 = vmatpush.msra.mxu1 %v1627_v17  ;;  %424 = vmatpush.msrb.mxu2 %v1724_v49 }
  0x73   :  { %456 = vmatpush.msra.mxu0 %v1691_v37  ;;  %444 = vmatpush.msrb.mxu3 %v1726_v50 }
  0x74   :  { %561 = vmatpush.msra.mxu2 %v1588_v3  ;;  %548 = vmatpush.msra.mxu1 %v1637_v20 }
  0x75   :  { %457 = vmatpush.msra.mxu0 %v1701_v41 }
  0x76   :  { %562 = vmatpush.msra.mxu2 %v1594_v5  ;;  %549 = vmatpush.msra.mxu1 %v1647_v23 }
  0x77   :  { %458 = vmatpush.msra.mxu0 %v1711_v44 }
  0x78   :  { %563 = vmatpush.msra.mxu2 %v1598_v7  ;;  %550 = vmatpush.msra.mxu1 %v1663_v27 }
  0x79   :  { %459 = vmatpush.msra.mxu0 %v1721_v47 }
  0x7a   :  { %564 = vmatpush.msra.mxu2 %v1604_v10  ;;  %551 = vmatpush.msra.mxu1 %v1672_v31 }
  0x7b   :  { %460 = vmatpush.msra.mxu0 %v1735_v52 }
  0x7c   :  { %565 = vmatpush.msra.mxu2 %v1611_v12  ;;  %552 = vmatpush.msra.mxu1 %v1683_v35 }
  0x7d   :  { %461 = vmatpush.msra.mxu0 %v1743_v54 }
  0x7e   :  { %566 = vmatpush.msra.mxu2 %v1618_v14  ;;  %553 = vmatpush.msra.mxu1 %v1693_v38 }
  0x7f   :  { %462 = vmatpush.msra.mxu0 %v1748_v56 }
  0x80   :  { %567 = vmatpush.msra.mxu2 %v1629_v18  ;;  %554 = vmatpush.msra.mxu1 %v1703_v42 }
  0x81   :  { %463 = vmatpush.msra.mxu0 %v1756_v58 }
  0x82   :  { %568 = vmatpush.msra.mxu2 %v1639_v21  ;;  %555 = vmatpush.msra.mxu1 %v1713_v45 }
  0x83   :  { %464 = vmatpush.msra.mxu0 %v1761_v59 }
  0x84   :  { %569 = vmatpush.msra.mxu2 %v1649_v24  ;;  %556 = vmatpush.msra.mxu1 %v1724_v49 }
  0x86   :  { %570 = vmatpush.msra.mxu2 %v1665_v28 }
  0x88   :  { %571 = vmatpush.msra.mxu2 %v1676_v33 }
  0x8a   :  { %572 = vmatpush.msra.mxu2 %v1685_v36 }
  0x8c   :  { %573 = vmatpush.msra.mxu2 %v1695_v39 }
  0x8e   :  { %574 = vmatpush.msra.mxu2 %v1705_v43 }
  0x90   :  { %575 = vmatpush.msra.mxu2 %v1715_v46 }
  0x92   :  { %576 = vmatpush.msra.mxu2 %v1726_v50 }
  0xc1   :  { %v158_v40 = vpop.f32.mrf.mxu0 }
  0xc2   :  { %v181_v53 = vpop.f32.mrf.mxu1  ;;  %v159_v55 = vadd.f32 %v1892_v1, %v158_v40  ;;  %v2367_v40 = vmov 0.0  }
  0xc3   :  { %v182_v60 = vadd.f32 %v1897_v8, %v181_v53  ;;  %v1263_v1 = vsel %vm1262_vm6, 1.0, %v2367_v40 }
  0xc4   :  { %v207_v61 = vadd.f32 %v159_v55, %v135_v30  ;;  %v1251_v30 = vsel %vm1250_vm7, 1.0, %v2367_v40  ;;  %919 = vperm.xlu1 %1283, %v1263_v1  }
  0xc5   :  { %v227_v0 = vadd.f32 %v182_v60, %v136_v48  ;;  %523 = vperm.xlu2 %1284, %v1251_v30   ;;  %v529_v40 = vsub.f32 1.0, %v1251_v30 }
  0xc6   :  { %v1240_v29 = vmul.f32 -1.442695, %v207_v61 }
  0xc7   :  { %v1241_v50 = vmul.f32 -1.442695, %v227_v0 }
  0xc8   :  { %1288 = vpow2.f32 %v1240_v29 }
  0xc9   :  { %1290 = vpow2.f32 %v1241_v50 }
  0xcd   :  { %532 = vperm.xlu2 %1284, %v529_v40   ;;  %v2375_v40 = vld [vmem:[#allocation20_spill] sm:$0xff] }
  0xce   :  { %v1289_v49 = vpop.eup %1288 }
  0xcf   :  { %v1291_v59 = vpop.eup %1290  ;;  %v211_v46 = vadd.f32 1.0, %v1289_v49  ;;  %v1908_v49 = vld [vmem:[%s2318_s4 + $0x2] ss:$0 sm:$0xff] }
  0xd0   :  { %v231_v45 = vadd.f32 1.0, %v1291_v59  ;;  %v1057_v59 = vsub.f32 1.0, %v1782_v62  ;;  %v204_v25 = vpop.f32.mrf.mxu2  ;;  %v137_v62 = vld [vmem:[#allocation4 + $0x10] sm:$0xff] }
  0xd1   :  { %1292 = vrcp.f32 %v211_v46  ;;  %v223_v60 = vand.u32 2147483648, %v211_v46  ;;  %v221_v0 = vand.u32 2147483647, %v211_v46  ;;  %v205_v43 = vadd.f32 %v1908_v49, %v204_v25  ;;  %v261_v25 = vpop.permute.xlu0 %260 }
  0xd2   :  { %1294 = vrcp.f32 %v231_v45  ;;  %vm217_vm9 = vweird.f32 %v211_v46  ;;  %1060 = vperm.xlu1 %1283, %v1057_v59   ;;  %vm237_vm12 = vweird.f32 %v231_v45  ;;  %v241_v54 = vand.u32 2147483647, %v231_v45 }
  0xd3   :  { %v224_v56 = vor.u32 1.1754944e-38, %v223_v60  ;;  %vm222_vm11 = vcmp.eq.f32.partialorder %v221_v0, 8.507059e+37  ;;  %v925_v59 = vsub.f32 1.0, %v1263_v1  ;;  %v2372_v1 = vld [vmem:[#allocation18_spill] sm:$0xff] }
  0xd4   :  { %vm242_vm15 = vcmp.eq.f32.partialorder %v241_v54, 8.507059e+37  ;;  %v2369_v54 = vld [vmem:[#allocation16_spill] sm:$0xff]  ;;  %v2374_v0 = vld [vmem:[#allocation26_spill] sm:$0xff] }
  0xd5   :  { %787 = vperm.xlu2 %1284, %v1753_v57   ;;  %v2370_v57 = vld [vmem:[#allocation17_spill] sm:$0xff] }
  0xd7   :  { %v1293_v58 = vpop.eup %1292 }
  0xd8   :  { %v1295_v48 = vpop.eup %1294  ;;  %v213_v53 = vmul.f32 %v1293_v58, %v211_v46  ;;  %vm218_vm8 = vweird.f32 %v1293_v58 }
  0xd9   :  { %v233_v29 = vmul.f32 %v1295_v48, %v231_v45  ;;  %vm219_vm10 = vmor %vm217_vm9, %vm218_vm8  ;;  %vm238_vm13 = vweird.f32 %v1295_v48 }
  0xda   :  { %v214_v50 = vsub.f32 1.0, %v213_v53  ;;  %vm239_vm14 = vmor %vm237_vm12, %vm238_vm13 }
  0xdb   :  { %v234_v55 = vsub.f32 1.0, %v233_v29 }
  0xdc   :  { %v215_v61 = vmul.f32 %v1293_v58, %v214_v50  ;;  %v243_v50 = vand.u32 2147483648, %v231_v45 }
  0xdd   :  { %v235_v8 = vmul.f32 %v1295_v48, %v234_v55  ;;  %928 = vperm.xlu2 %1284, %v925_v59  }
  0xde   :  { %v216_v42 = vadd.f32 %v1293_v58, %v215_v61  ;;  %v244_v61 = vor.u32 1.1754944e-38, %v243_v50  ;;  %v2379_v50 = vld [vmem:[#allocation23_spill] sm:$0xff] }
  0xdf   :  { %v236_v29 = vadd.f32 %v1295_v48, %v235_v8  ;;  %v269_v8 = vpop.permute.xlu0 %268 }
  0xe0   :  { %v220_v39 = vsel %vm219_vm10, %v1293_v58, %v216_v42 }
  0xe1   :  { %v225_v53 = vsel %vm222_vm11, %v224_v56, %v220_v39  ;;  %v240_v55 = vsel %vm239_vm14, %v1295_v48, %v236_v29  ;;  %v2373_v48 = vld [vmem:[#allocation19_spill] sm:$0xff]  ;;  %v2378_v29 = vld [vmem:[#allocation22_spill] sm:$0xff] }
  0xe2   :  { %v247_v38 = vmul.f32 %v225_v53, %v205_v43  ;;  %v245_v46 = vsel %vm242_vm15, %v244_v61, %v240_v55  ;;  %v271_v43 = vmul.f32 %v269_v8, %v1732_v51  ;;  %v2377_v53 = vld [vmem:[#allocation27_spill] sm:$0xff] }
  0xe3   :  { %v250_v42 = vsub.f32 1.0, %v245_v46  ;;  %v252_v39 = vmul.f32 %v245_v46, %v1732_v51  ;;  %v2368_v51 = vld [vmem:[#allocation24_spill] sm:$0xff] }
  0xe4   :  { %v248_v30 = vadd.f32 %v247_v38, %v137_v62  ;;  %v2376_v62 = vld [vmem:[#allocation21_spill] sm:$0xff] }
  0xe5   :  { %1183 = vperm.xlu2 %1284, %v1794_v63   ;;  %v2371_v63 = vld [vmem:[#allocation25_spill] sm:$0xff] }
  0xe6   :  { %1296 = vtanh.f32 %v248_v30  ;;  %v275_v30 = vld [vmem:[#allocation4 + $0x20] sm:$0xff] }
  0xec   :  { %v1297_v58 = vpop.eup %1296 }
  0xed   :  { %v251_v60 = vmul.f32 %v1297_v58, %v250_v42  ;;  %v274_v58 = vld [vmem:[#allocation4 + $0x18] sm:$0xff] }
  0xef   :  { %v253_v56 = vadd.f32 %v252_v39, %v251_v60  ;;  %v2381_v60 = vld [vmem:[#allocation28_spill] sm:$0xff] }
  0xf1   :  { %v263_v38 = vmul.f32 %v261_v25, %v253_v56  ;;  %v2380_v25 = vld [vmem:[#allocation29_spill] sm:$0xff] }
  0xf3   :  { %264 = vst [vmem:[#allocation9] sm:$0xff] %v263_v38  ;;  %v1915_v45 = vadd.f32 %v271_v43, %v263_v38 }
  0xf5   :  { %293 = vmatmul.f32.vlgmr.msra.gmra.mxu3 %v1915_v45  ;;  %313 = vmatmul.f32.vlgmr.msrb.gmra.mxu0 %v1915_v45 }
  0xf6   :  { %333 = vmatmul.f32.vlgmr.msrb.gmra.mxu1 %v1915_v45  ;;  %581 = vmatpush.msra.mxu3 %v1620_v15 }
  0xf7   :  { %673 = vmatpush.msrb.mxu0 %v1586_v2  ;;  %693 = vmatpush.msrb.mxu1 %v1588_v3 }
  0xf8   :  { %582 = vmatpush.msra.mxu3 %v1625_v16 }
  0xf9   :  { %674 = vmatpush.msrb.mxu0 %v1590_v4  ;;  %694 = vmatpush.msrb.mxu1 %v1594_v5 }
  0xfa   :  { %583 = vmatpush.msra.mxu3 %v1635_v19 }
  0xfb   :  { %675 = vmatpush.msrb.mxu0 %v1596_v6  ;;  %695 = vmatpush.msrb.mxu1 %v1598_v7 }
  0xfc   :  { %584 = vmatpush.msra.mxu3 %v1645_v22 }
  0xfd   :  { %676 = vmatpush.msrb.mxu0 %v1602_v9  ;;  %696 = vmatpush.msrb.mxu1 %v1604_v10 }
  0xfe   :  { %585 = vmatpush.msra.mxu3 %v1660_v26 }
  0xff   :  { %677 = vmatpush.msrb.mxu0 %v1609_v11  ;;  %697 = vmatpush.msrb.mxu1 %v1611_v12 }
 0x100   :  { %586 = vmatpush.msra.mxu3 %v1674_v32 }
 0x101   :  { %678 = vmatpush.msrb.mxu0 %v1616_v13  ;;  %698 = vmatpush.msrb.mxu1 %v1618_v14 }
 0x102   :  { %587 = vmatpush.msra.mxu3 %v1681_v34 }
 0x103   :  { %679 = vmatpush.msrb.mxu0 %v1627_v17  ;;  %699 = vmatpush.msrb.mxu1 %v1629_v18 }
 0x104   :  { %588 = vmatpush.msra.mxu3 %v1691_v37 }
 0x105   :  { %680 = vmatpush.msrb.mxu0 %v1637_v20  ;;  %700 = vmatpush.msrb.mxu1 %v1639_v21 }
 0x106   :  { %589 = vmatpush.msra.mxu3 %v1701_v41 }
 0x107   :  { %681 = vmatpush.msrb.mxu0 %v1647_v23  ;;  %701 = vmatpush.msrb.mxu1 %v1649_v24 }
 0x108   :  { %590 = vmatpush.msra.mxu3 %v1711_v44 }
 0x109   :  { %682 = vmatpush.msrb.mxu0 %v1663_v27  ;;  %702 = vmatpush.msrb.mxu1 %v1665_v28 }
 0x10a   :  { %591 = vmatpush.msra.mxu3 %v1721_v47 }
 0x10b   :  { %683 = vmatpush.msrb.mxu0 %v1672_v31  ;;  %703 = vmatpush.msrb.mxu1 %v1676_v33 }
 0x10c   :  { %592 = vmatpush.msra.mxu3 %v1735_v52 }
 0x10d   :  { %684 = vmatpush.msrb.mxu0 %v1683_v35  ;;  %704 = vmatpush.msrb.mxu1 %v1685_v36 }
 0x10e   :  { %593 = vmatpush.msra.mxu3 %v2368_v51 }
 0x10f   :  { %685 = vmatpush.msrb.mxu0 %v2369_v54  ;;  %705 = vmatpush.msrb.mxu1 %v2370_v57 }
 0x110   :  { %594 = vmatpush.msra.mxu3 %v2371_v63 }
 0x111   :  { %686 = vmatpush.msrb.mxu0 %v2372_v1  ;;  %706 = vmatpush.msrb.mxu1 %v2373_v48  ;;  %v392_v48 = vpop.permute.xlu1 %391 }
 0x112   :  { %595 = vmatpush.msra.mxu3 %v2374_v0 }
 0x113   :  { %687 = vmatpush.msrb.mxu0 %v2375_v40  ;;  %707 = vmatpush.msrb.mxu1 %v2376_v62 }
 0x114   :  { %596 = vmatpush.msra.mxu3 %v2377_v53 }
 0x115   :  { %688 = vmatpush.msrb.mxu0 %v2378_v29  ;;  %708 = vmatpush.msrb.mxu1 %v2379_v50 }
 0x172   :  { %v314_v55 = vpop.f32.mrf.mxu0 }
 0x173   :  { %v315_v61 = vadd.f32 %v2380_v25, %v314_v55 }
 0x175   :  { %v357_v46 = vadd.f32 %v315_v61, %v275_v30 }
 0x177   :  { %v1245_v42 = vmul.f32 -1.442695, %v357_v46 }
 0x178   :  { %v294_v59 = vpop.f32.mrf.mxu3 }
 0x179   :  { %1298 = vpow2.f32 %v1245_v42  ;;  %v295_v39 = vadd.f32 %v2381_v60, %v294_v59  ;;  %v276_v60 = vld [vmem:[#allocation4 + $0x28] sm:$0xff] }
 0x17b   :  { %v337_v56 = vadd.f32 %v295_v39, %v274_v58  ;;  %v334_v58 = vpop.f32.mrf.mxu1 }
 0x17d   :  { %v1244_v8 = vmul.f32 -1.442695, %v337_v56 }
 0x17f   :  { %v1299_v43 = vpop.eup %1298  ;;  %1300 = vpow2.f32 %v1244_v8  ;;  %v335_v8 = vadd.f32 %v1908_v49, %v334_v58 }
 0x180   :  { %v361_v38 = vadd.f32 1.0, %v1299_v43 }
 0x182   :  { %1302 = vrcp.f32 %v361_v38  ;;  %vm367_vm5 = vweird.f32 %v361_v38 }
 0x185   :  { %v1301_v29 = vpop.eup %1300 }
 0x186   :  { %v341_v53 = vadd.f32 1.0, %v1301_v29 }
 0x188   :  { %1304 = vrcp.f32 %v341_v53  ;;  %v1303_v50 = vpop.eup %1302  ;;  %v353_v46 = vand.u32 2147483648, %v341_v53  ;;  %v351_v42 = vand.u32 2147483647, %v341_v53  ;;  %vm347_vm1 = vweird.f32 %v341_v53 }
 0x189   :  { %v363_v62 = vmul.f32 %v1303_v50, %v361_v38  ;;  %vm368_vm4 = vweird.f32 %v1303_v50 }
 0x18a   :  { %v354_v56 = vor.u32 1.1754944e-38, %v353_v46  ;;  %vm352_vm3 = vcmp.eq.f32.partialorder %v351_v42, 8.507059e+37  ;;  %vm369_vm6 = vmor %vm367_vm5, %vm368_vm4 }
 0x18b   :  { %v364_v30 = vsub.f32 1.0, %v363_v62  ;;  %v373_v62 = vand.u32 2147483648, %v361_v38 }
 0x18d   :  { %v365_v59 = vmul.f32 %v1303_v50, %v364_v30 }
 0x18e   :  { %v1305_v40 = vpop.eup %1304 }
 0x18f   :  { %v343_v55 = vmul.f32 %v1305_v40, %v341_v53  ;;  %vm348_vm0 = vweird.f32 %v1305_v40  ;;  %v366_v43 = vadd.f32 %v1303_v50, %v365_v59  ;;  %v401_v59 = vpop.permute.xlu1 %400 }
 0x190   :  { %vm349_vm2 = vmor %vm347_vm1, %vm348_vm0 }
 0x191   :  { %v344_v61 = vsub.f32 1.0, %v343_v55  ;;  %v370_v1 = vsel %vm369_vm6, %v1303_v50, %v366_v43 }
 0x193   :  { %v345_v25 = vmul.f32 %v1305_v40, %v344_v61  ;;  %v371_v61 = vand.u32 2147483647, %v361_v38 }
 0x195   :  { %v346_v39 = vadd.f32 %v1305_v40, %v345_v25  ;;  %v374_v25 = vor.u32 1.1754944e-38, %v373_v62  ;;  %vm372_vm7 = vcmp.eq.f32.partialorder %v371_v61, 8.507059e+37 }
 0x197   :  { %v350_v29 = vsel %vm349_vm2, %v1305_v40, %v346_v39  ;;  %v375_v53 = vsel %vm372_vm7, %v374_v25, %v370_v1 }
 0x198   :  { %v355_v0 = vsel %vm352_vm3, %v354_v56, %v350_v29  ;;  %v380_v46 = vsub.f32 1.0, %v375_v53  ;;  %v382_v42 = vmul.f32 %v375_v53, %v1915_v45  ;;  %v403_v56 = vmul.f32 %v401_v59, %v1915_v45 }
 0x199   :  { %v377_v55 = vmul.f32 %v355_v0, %v335_v8  ;;  %v408_v8 = vld [vmem:[#allocation4 + $0x40] sm:$0xff] }
 0x19b   :  { %v378_v30 = vadd.f32 %v377_v55, %v276_v60 }
 0x19d   :  { %1306 = vtanh.f32 %v378_v30  ;;  %v524_v30 = vpop.permute.xlu2 %523 }
 0x1a3   :  { %v1307_v58 = vpop.eup %1306 }
 0x1a4   :  { %v381_v40 = vmul.f32 %v1307_v58, %v380_v46 }
 0x1a6   :  { %v383_v39 = vadd.f32 %v382_v42, %v381_v40 }
 0x1a8   :  { %v394_v0 = vmul.f32 %v392_v48, %v383_v39 }
 0x1aa   :  { %396 = vst [vmem:[#allocation9 + $0x8] sm:$0xff] %v394_v0  ;;  %v1974_v38 = vadd.f32 %v403_v56, %v394_v0  ;;  %v533_v56 = vpop.permute.xlu2 %532 }
 0x1ac   :  { %425 = vmatmul.f32.vlgmr.msrb.gmra.mxu2 %v1974_v38  ;;  %445 = vmatmul.f32.vlgmr.msrb.gmra.mxu3 %v1974_v38 }
 0x1ad   :  { %465 = vmatmul.f32.vlgmr.msra.gmra.mxu0 %v1974_v38  ;;  %713 = vmatpush.msrb.mxu2 %v1620_v15  ;;  %v2390_v15 = vld [vmem:[#allocation28_spill] sm:$0xff] }
 0x1ae   :  { %805 = vmatpush.msrb.mxu3 %v1586_v2  ;;  %825 = vmatpush.msra.mxu0 %v1588_v3  ;;  %v2382_v2 = vld [vmem:[#allocation18_spill] sm:$0xff]  ;;  %v2383_v3 = vld [vmem:[#allocation19_spill] sm:$0xff] }
 0x1af   :  { %714 = vmatpush.msrb.mxu2 %v1625_v16 }
 0x1b0   :  { %806 = vmatpush.msrb.mxu3 %v1590_v4  ;;  %826 = vmatpush.msra.mxu0 %v1594_v5  ;;  %v2384_v4 = vld [vmem:[#allocation26_spill] sm:$0xff]  ;;  %v2385_v5 = vld [vmem:[#allocation20_spill] sm:$0xff] }
 0x1b1   :  { %715 = vmatpush.msrb.mxu2 %v1635_v19 }
 0x1b2   :  { %807 = vmatpush.msrb.mxu3 %v1596_v6  ;;  %827 = vmatpush.msra.mxu0 %v1598_v7  ;;  %v2386_v6 = vld [vmem:[#allocation21_spill] sm:$0xff]  ;;  %v2387_v7 = vld [vmem:[#allocation27_spill] sm:$0xff] }
 0x1b3   :  { %716 = vmatpush.msrb.mxu2 %v1645_v22 }
 0x1b4   :  { %808 = vmatpush.msrb.mxu3 %v1602_v9  ;;  %828 = vmatpush.msra.mxu0 %v1604_v10  ;;  %v2388_v9 = vld [vmem:[#allocation22_spill] sm:$0xff]  ;;  %v2389_v10 = vld [vmem:[#allocation23_spill] sm:$0xff] }
 0x1b5   :  { %717 = vmatpush.msrb.mxu2 %v1660_v26 }
 0x1b6   :  { %809 = vmatpush.msrb.mxu3 %v1609_v11  ;;  %829 = vmatpush.msra.mxu0 %v1611_v12  ;;  %v406_v11 = vld [vmem:[#allocation4 + $0x30] sm:$0xff] }
 0x1b7   :  { %718 = vmatpush.msrb.mxu2 %v1674_v32 }
 0x1b8   :  { %810 = vmatpush.msrb.mxu3 %v1616_v13  ;;  %830 = vmatpush.msra.mxu0 %v1618_v14  ;;  %v407_v13 = vld [vmem:[#allocation4 + $0x38] sm:$0xff] }
 0x1b9   :  { %719 = vmatpush.msrb.mxu2 %v1681_v34 }
 0x1ba   :  { %811 = vmatpush.msrb.mxu3 %v1627_v17  ;;  %831 = vmatpush.msra.mxu0 %v1629_v18  ;;  %v2391_v17 = vld [vmem:[#allocation29_spill] sm:$0xff] }
 0x1bb   :  { %720 = vmatpush.msrb.mxu2 %v1691_v37 }
 0x1bc   :  { %812 = vmatpush.msrb.mxu3 %v1637_v20  ;;  %832 = vmatpush.msra.mxu0 %v1639_v21 }
 0x1bd   :  { %721 = vmatpush.msrb.mxu2 %v1701_v41 }
 0x1be   :  { %813 = vmatpush.msrb.mxu3 %v1647_v23  ;;  %833 = vmatpush.msra.mxu0 %v1649_v24 }
 0x1bf   :  { %722 = vmatpush.msrb.mxu2 %v1711_v44 }
 0x1c0   :  { %814 = vmatpush.msrb.mxu3 %v1663_v27  ;;  %834 = vmatpush.msra.mxu0 %v1665_v28 }
 0x1c1   :  { %723 = vmatpush.msrb.mxu2 %v1721_v47 }
 0x1c2   :  { %815 = vmatpush.msrb.mxu3 %v1672_v31  ;;  %835 = vmatpush.msra.mxu0 %v1676_v33 }
 0x1c3   :  { %724 = vmatpush.msrb.mxu2 %v1735_v52 }
 0x1c4   :  { %816 = vmatpush.msrb.mxu3 %v1683_v35  ;;  %836 = vmatpush.msra.mxu0 %v1685_v36 }
 0x1c5   :  { %725 = vmatpush.msrb.mxu2 %v2368_v51 }
 0x1c6   :  { %817 = vmatpush.msrb.mxu3 %v2369_v54  ;;  %837 = vmatpush.msra.mxu0 %v2370_v57 }
 0x1c7   :  { %726 = vmatpush.msrb.mxu2 %v2371_v63 }
 0x1c8   :  { %818 = vmatpush.msrb.mxu3 %v2382_v2  ;;  %838 = vmatpush.msra.mxu0 %v2383_v3  ;;  %v535_v2 = vmul.f32 %v533_v56, %v1974_v38 }
 0x1c9   :  { %727 = vmatpush.msrb.mxu2 %v2384_v4 }
 0x1ca   :  { %819 = vmatpush.msrb.mxu3 %v2385_v5  ;;  %839 = vmatpush.msra.mxu0 %v2386_v6  ;;  %v2037_v6 = vld [vmem:[#allocation7 + $0x178] sm:$0xff] }
 0x1cb   :  { %728 = vmatpush.msrb.mxu2 %v2387_v7 }
 0x1cc   :  { %820 = vmatpush.msrb.mxu3 %v2388_v9  ;;  %840 = vmatpush.msra.mxu0 %v2389_v10  ;;  %v2040_v9 = vld [vmem:[#allocation7 + $0x78] sm:$0xff] }
 0x1cd   :  { %v2043_v10 = vld [vmem:[#allocation7 + $0xf8] sm:$0xff] }
 0x22a   :  { %v466_v54 = vpop.f32.mrf.mxu0 }
 0x22b   :  { %v467_v50 = vadd.f32 %v1908_v49, %v466_v54  ;;  %v2120_v54 = vld [vmem:[#allocation7 + $0xb0] sm:$0xff] }
 0x22f   :  { %v426_v12 = vpop.f32.mrf.mxu2  ;;  %v446_v14 = vpop.f32.mrf.mxu3 }
 0x230   :  { %v427_v16 = vadd.f32 %v2390_v15, %v426_v12  ;;  %v447_v18 = vadd.f32 %v2391_v17, %v446_v14  ;;  %v2052_v12 = vld [vmem:[#allocation7 + $0xf0] sm:$0xff]  ;;  %v2058_v14 = vld [vmem:[#allocation7 + $0x68] sm:$0xff] }
 0x232   :  { %v469_v19 = vadd.f32 %v427_v16, %v406_v11  ;;  %v489_v20 = vadd.f32 %v447_v18, %v407_v13  ;;  %v2049_v11 = vld [vmem:[#allocation7 + $0x70] sm:$0xff]  ;;  %v2055_v13 = vld [vmem:[#allocation7 + $0x168] sm:$0xff]  ;;  %v2064_v18 = vld [vmem:[#allocation7 + $0x160] sm:$0xff] }
 0x233   :  { %v2061_v16 = vld [vmem:[#allocation7 + $0xe8] sm:$0xff] }
 0x234   :  { %v1248_v21 = vmul.f32 -1.442695, %v469_v19  ;;  %v1249_v22 = vmul.f32 -1.442695, %v489_v20  ;;  %v2067_v19 = vld [vmem:[#allocation7 + $0x60] sm:$0xff] }
 0x235   :  { %v2070_v20 = vld [vmem:[#allocation7 + $0xe0] sm:$0xff] }
 0x236   :  { %1308 = vpow2.f32 %v1248_v21  ;;  %v2073_v21 = vld [vmem:[#allocation7 + $0x158] sm:$0xff] }
 0x237   :  { %1310 = vpow2.f32 %v1249_v22  ;;  %v2076_v22 = vld [vmem:[#allocation7 + $0x58] sm:$0xff] }
 0x23c   :  { %v1309_v23 = vpop.eup %1308 }
 0x23d   :  { %v1311_v24 = vpop.eup %1310  ;;  %v473_v26 = vadd.f32 1.0, %v1309_v23  ;;  %v2079_v23 = vld [vmem:[#allocation7 + $0xd8] sm:$0xff] }
 0x23e   :  { %v493_v27 = vadd.f32 1.0, %v1311_v24  ;;  %v2082_v24 = vld [vmem:[#allocation7 + $0x150] sm:$0xff] }
 0x23f   :  { %1312 = vrcp.f32 %v473_v26  ;;  %v485_v35 = vand.u32 2147483648, %v473_v26  ;;  %v483_v45 = vand.u32 2147483647, %v473_v26  ;;  %vm479_vm9 = vweird.f32 %v473_v26 }
 0x240   :  { %1314 = vrcp.f32 %v493_v27  ;;  %v505_v55 = vand.u32 2147483648, %v493_v27  ;;  %vm499_vm13 = vweird.f32 %v493_v27  ;;  %v503_v61 = vand.u32 2147483647, %v493_v27 }
 0x241   :  { %v486_v48 = vor.u32 1.1754944e-38, %v485_v35  ;;  %vm484_vm11 = vcmp.eq.f32.partialorder %v483_v45, 8.507059e+37  ;;  %v2106_v35 = vld [vmem:[#allocation7 + $0xc0] sm:$0xff]  ;;  %v2117_v45 = vld [vmem:[#allocation7 + $0x30] sm:$0xff] }
 0x242   :  { %v506_v46 = vor.u32 1.1754944e-38, %v505_v55  ;;  %vm504_vm15 = vcmp.eq.f32.partialorder %v503_v61, 8.507059e+37  ;;  %v539_v61 = vld [vmem:[#allocation4 + $0x50] sm:$0xff] }
 0x245   :  { %v1313_v28 = vpop.eup %1312 }
 0x246   :  { %v1315_v31 = vpop.eup %1314  ;;  %v475_v32 = vmul.f32 %v1313_v28, %v473_v26  ;;  %vm480_vm8 = vweird.f32 %v1313_v28  ;;  %v2085_v26 = vld [vmem:[#allocation7 + $0x50] sm:$0xff] }
 0x247   :  { %v495_v33 = vmul.f32 %v1315_v31, %v493_v27  ;;  %vm481_vm10 = vmor %vm479_vm9, %vm480_vm8  ;;  %vm500_vm12 = vweird.f32 %v1315_v31  ;;  %v2088_v27 = vld [vmem:[#allocation7 + $0xd0] sm:$0xff] }
 0x248   :  { %v476_v34 = vsub.f32 1.0, %v475_v32  ;;  %vm501_vm14 = vmor %vm499_vm13, %vm500_vm12  ;;  %v2097_v32 = vld [vmem:[#allocation7 + $0xc8] sm:$0xff] }
 0x249   :  { %v496_v36 = vsub.f32 1.0, %v495_v33  ;;  %v2100_v33 = vld [vmem:[#allocation7 + $0x140] sm:$0xff] }
 0x24a   :  { %v477_v37 = vmul.f32 %v1313_v28, %v476_v34  ;;  %v2103_v34 = vld [vmem:[#allocation7 + $0x40] sm:$0xff] }
 0x24b   :  { %v497_v57 = vmul.f32 %v1315_v31, %v496_v36  ;;  %v2110_v36 = vld [vmem:[#allocation7 + $0x38] sm:$0xff] }
 0x24c   :  { %v478_v1 = vadd.f32 %v1313_v28, %v477_v37  ;;  %v2113_v37 = vld [vmem:[#allocation7 + $0xb8] sm:$0xff] }
 0x24d   :  { %v498_v43 = vadd.f32 %v1315_v31, %v497_v57  ;;  %v2127_v57 = vld [vmem:[#allocation7 + $0xa8] sm:$0xff] }
 0x24e   :  { %v482_v60 = vsel %vm481_vm10, %v1313_v28, %v478_v1  ;;  %v2091_v28 = vld [vmem:[#allocation7 + $0x148] sm:$0xff]  ;;  %v2134_v1 = vld [vmem:[#allocation7 + $0xa0] sm:$0xff] }
 0x24f   :  { %v487_v29 = vsel %vm484_vm11, %v486_v48, %v482_v60  ;;  %v502_v53 = vsel %vm501_vm14, %v1315_v31, %v498_v43  ;;  %v2094_v31 = vld [vmem:[#allocation7 + $0x48] sm:$0xff]  ;;  %v2141_v48 = vld [vmem:[#allocation7 + $0x98] sm:$0xff] }
 0x250   :  { %v509_v62 = vmul.f32 %v487_v29, %v467_v50  ;;  %v507_v58 = vsel %vm504_vm15, %v506_v46, %v502_v53  ;;  %v2148_v50 = vld [vmem:[#allocation7 + $0x90] sm:$0xff]  ;;  %v2155_v60 = vld [vmem:[#allocation7 + $0x88] sm:$0xff] }
 0x251   :  { %v512_v40 = vsub.f32 1.0, %v507_v58  ;;  %v514_v39 = vmul.f32 %v507_v58, %v1974_v38  ;;  %v2046_v38 = vld [vmem:[#allocation7 + $0x170] sm:$0xff]  ;;  %v538_v29 = vld [vmem:[#allocation4 + $0x48] sm:$0xff] }
 0x252   :  { %v510_v25 = vadd.f32 %v509_v62, %v408_v8  ;;  %v2162_v8 = vld [vmem:[#allocation7 + $0x80] sm:$0xff] }
 0x254   :  { %1316 = vtanh.f32 %v510_v25 }
 0x25a   :  { %v1317_v42 = vpop.eup %1316 }
 0x25b   :  { %v513_v59 = vmul.f32 %v1317_v42, %v512_v40 }
 0x25d   :  { %v515_v0 = vadd.f32 %v514_v39, %v513_v59 }
 0x25f   :  { %v526_v3 = vmul.f32 %v524_v30, %v515_v0 }
 0x261   :  { %528 = vst [vmem:[#allocation9 + $0x10] sm:$0xff] %v526_v3  ;;  %v2032_v5 = vadd.f32 %v535_v2, %v526_v3 }
 0x263   :  { %557 = vmatmul.f32.vlgmr.msra.gmra.mxu1 %v2032_v5  ;;  %577 = vmatmul.f32.vlgmr.msra.gmra.mxu2 %v2032_v5 }
 0x264   :  { %597 = vmatmul.f32.vlgmr.msra.gmra.mxu3 %v2032_v5  ;;  %845 = vmatpush.msra.mxu1 %v2037_v6 }
 0x265   :  { %937 = vmatpush.msra.mxu2 %v2040_v9  ;;  %957 = vmatpush.msra.mxu3 %v2043_v10 }
 0x266   :  { %846 = vmatpush.msra.mxu1 %v2046_v38 }
 0x267   :  { %938 = vmatpush.msra.mxu2 %v2049_v11  ;;  %958 = vmatpush.msra.mxu3 %v2052_v12 }
 0x268   :  { %847 = vmatpush.msra.mxu1 %v2055_v13 }
 0x269   :  { %939 = vmatpush.msra.mxu2 %v2058_v14  ;;  %959 = vmatpush.msra.mxu3 %v2061_v16 }
 0x26a   :  { %848 = vmatpush.msra.mxu1 %v2064_v18 }
 0x26b   :  { %940 = vmatpush.msra.mxu2 %v2067_v19  ;;  %960 = vmatpush.msra.mxu3 %v2070_v20 }
 0x26c   :  { %849 = vmatpush.msra.mxu1 %v2073_v21 }
 0x26d   :  { %941 = vmatpush.msra.mxu2 %v2076_v22  ;;  %961 = vmatpush.msra.mxu3 %v2079_v23 }
 0x26e   :  { %850 = vmatpush.msra.mxu1 %v2082_v24 }
 0x26f   :  { %942 = vmatpush.msra.mxu2 %v2085_v26  ;;  %962 = vmatpush.msra.mxu3 %v2088_v27 }
 0x270   :  { %851 = vmatpush.msra.mxu1 %v2091_v28 }
 0x271   :  { %943 = vmatpush.msra.mxu2 %v2094_v31  ;;  %963 = vmatpush.msra.mxu3 %v2097_v32 }
 0x272   :  { %852 = vmatpush.msra.mxu1 %v2100_v33 }
 0x273   :  { %944 = vmatpush.msra.mxu2 %v2103_v34  ;;  %964 = vmatpush.msra.mxu3 %v2106_v35 }
 0x274   :  { %853 = vmatpush.msra.mxu1 %v1701_v41  ;;  %v2124_v41 = vld [vmem:[#allocation7 + $0x28] sm:$0xff] }
 0x275   :  { %945 = vmatpush.msra.mxu2 %v2110_v36  ;;  %965 = vmatpush.msra.mxu3 %v2113_v37 }
 0x276   :  { %854 = vmatpush.msra.mxu1 %v1711_v44  ;;  %v2131_v44 = vld [vmem:[#allocation7 + $0x20] sm:$0xff] }
 0x277   :  { %946 = vmatpush.msra.mxu2 %v2117_v45  ;;  %966 = vmatpush.msra.mxu3 %v2120_v54 }
 0x278   :  { %855 = vmatpush.msra.mxu1 %v1721_v47  ;;  %v2138_v47 = vld [vmem:[#allocation7 + $0x18] sm:$0xff] }
 0x279   :  { %947 = vmatpush.msra.mxu2 %v2124_v41  ;;  %967 = vmatpush.msra.mxu3 %v2127_v57 }
 0x27a   :  { %856 = vmatpush.msra.mxu1 %v1735_v52  ;;  %v2145_v52 = vld [vmem:[#allocation7 + $0x10] sm:$0xff] }
 0x27b   :  { %948 = vmatpush.msra.mxu2 %v2131_v44  ;;  %968 = vmatpush.msra.mxu3 %v2134_v1 }
 0x27c   :  { %857 = vmatpush.msra.mxu1 %v2368_v51  ;;  %v2152_v51 = vld [vmem:[#allocation7 + $0x8] sm:$0xff] }
 0x27d   :  { %949 = vmatpush.msra.mxu2 %v2138_v47  ;;  %969 = vmatpush.msra.mxu3 %v2141_v48 }
 0x27e   :  { %858 = vmatpush.msra.mxu1 %v2371_v63  ;;  %v2159_v63 = vld [vmem:[#allocation7] sm:$0xff] }
 0x27f   :  { %950 = vmatpush.msra.mxu2 %v2145_v52  ;;  %970 = vmatpush.msra.mxu3 %v2148_v50 }
 0x280   :  { %859 = vmatpush.msra.mxu1 %v2384_v4 }
 0x281   :  { %951 = vmatpush.msra.mxu2 %v2152_v51  ;;  %971 = vmatpush.msra.mxu3 %v2155_v60 }
 0x282   :  { %860 = vmatpush.msra.mxu1 %v2387_v7 }
 0x283   :  { %952 = vmatpush.msra.mxu2 %v2159_v63  ;;  %972 = vmatpush.msra.mxu3 %v2162_v8 }
 0x2e0   :  { %v558_v4 = vpop.f32.mrf.mxu1 }
 0x2e1   :  { %v559_v43 = vadd.f32 %v2390_v15, %v558_v4 }
 0x2e3   :  { %v601_v62 = vadd.f32 %v559_v43, %v538_v29 }
 0x2e5   :  { %v1252_v55 = vmul.f32 -1.442695, %v601_v62 }
 0x2e6   :  { %v578_v30 = vpop.f32.mrf.mxu2 }
 0x2e7   :  { %1318 = vpow2.f32 %v1252_v55  ;;  %v579_v25 = vadd.f32 %v2391_v17, %v578_v30  ;;  %v598_v4 = vpop.f32.mrf.mxu3 }
 0x2e8   :  { %v599_v30 = vadd.f32 %v1908_v49, %v598_v4 }
 0x2e9   :  { %v621_v7 = vadd.f32 %v579_v25, %v539_v61 }
 0x2eb   :  { %v1253_v53 = vmul.f32 -1.442695, %v621_v7  ;;  %v540_v7 = vld [vmem:[#allocation4 + $0x58] sm:$0xff] }
 0x2ed   :  { %v1319_v46 = vpop.eup %1318  ;;  %1320 = vpow2.f32 %v1253_v53 }
 0x2ee   :  { %v605_v58 = vadd.f32 1.0, %v1319_v46 }
 0x2f0   :  { %1322 = vrcp.f32 %v605_v58  ;;  %v617_v0 = vand.u32 2147483648, %v605_v58  ;;  %v615_v3 = vand.u32 2147483647, %v605_v58  ;;  %vm611_vm1 = vweird.f32 %v605_v58 }
 0x2f2   :  { %v618_v55 = vor.u32 1.1754944e-38, %v617_v0  ;;  %vm616_vm3 = vcmp.eq.f32.partialorder %v615_v3, 8.507059e+37 }
 0x2f3   :  { %v1321_v40 = vpop.eup %1320 }
 0x2f4   :  { %v625_v42 = vadd.f32 1.0, %v1321_v40 }
 0x2f6   :  { %v1323_v59 = vpop.eup %1322  ;;  %1324 = vrcp.f32 %v625_v42  ;;  %v637_v40 = vand.u32 2147483648, %v625_v42  ;;  %vm631_vm5 = vweird.f32 %v625_v42 }
 0x2f7   :  { %v607_v39 = vmul.f32 %v1323_v59, %v605_v58  ;;  %vm612_vm0 = vweird.f32 %v1323_v59 }
 0x2f8   :  { %vm613_vm2 = vmor %vm611_vm1, %vm612_vm0 }
 0x2f9   :  { %v608_v56 = vsub.f32 1.0, %v607_v39 }
 0x2fb   :  { %v609_v2 = vmul.f32 %v1323_v59, %v608_v56  ;;  %v635_v56 = vand.u32 2147483647, %v625_v42 }
 0x2fc   :  { %v1325_v29 = vpop.eup %1324 }
 0x2fd   :  { %v627_v43 = vmul.f32 %v1325_v29, %v625_v42  ;;  %v610_v62 = vadd.f32 %v1323_v59, %v609_v2  ;;  %vm632_vm4 = vweird.f32 %v1325_v29  ;;  %v638_v2 = vor.u32 1.1754944e-38, %v637_v40  ;;  %v672_v40 = vld [vmem:[#allocation4 + $0x70] sm:$0xff] }
 0x2fe   :  { %vm633_vm6 = vmor %vm631_vm5, %vm632_vm4  ;;  %vm636_vm7 = vcmp.eq.f32.partialorder %v635_v56, 8.507059e+37 }
 0x2ff   :  { %v628_v61 = vsub.f32 1.0, %v627_v43  ;;  %v614_v25 = vsel %vm613_vm2, %v1323_v59, %v610_v62 }
 0x300   :  { %v619_v53 = vsel %vm616_vm3, %v618_v55, %v614_v25  ;;  %v656_v55 = vpop.permute.xlu0 %655 }
 0x301   :  { %v629_v46 = vmul.f32 %v1325_v29, %v628_v61  ;;  %v641_v39 = vmul.f32 %v619_v53, %v599_v30  ;;  %v665_v61 = vpop.permute.xlu1 %664 }
 0x302   :  { %v667_v30 = vmul.f32 %v665_v61, %v2032_v5 }
 0x303   :  { %v630_v17 = vadd.f32 %v1325_v29, %v629_v46  ;;  %v642_v15 = vadd.f32 %v641_v39, %v540_v7 }
 0x305   :  { %v634_v58 = vsel %vm633_vm6, %v1325_v29, %v630_v17  ;;  %1326 = vtanh.f32 %v642_v15  ;;  %v2199_v15 = vld [vmem:[#allocation7 + $0x138] sm:$0xff]  ;;  %v2204_v17 = vld [vmem:[#allocation7 + $0x130] sm:$0xff] }
 0x306   :  { %v639_v0 = vsel %vm636_vm7, %v638_v2, %v634_v58 }
 0x307   :  { %v644_v43 = vsub.f32 1.0, %v639_v0  ;;  %v646_v3 = vmul.f32 %v639_v0, %v2032_v5  ;;  %v2209_v5 = vld [vmem:[#allocation7 + $0x128] sm:$0xff] }
 0x30b   :  { %v1327_v4 = vpop.eup %1326 }
 0x30c   :  { %v645_v59 = vmul.f32 %v1327_v4, %v644_v43 }
 0x30e   :  { %v647_v62 = vadd.f32 %v646_v3, %v645_v59 }
 0x310   :  { %v658_v25 = vmul.f32 %v656_v55, %v647_v62 }
 0x312   :  { %660 = vst [vmem:[#allocation9 + $0x18] sm:$0xff] %v658_v25  ;;  %v2170_v42 = vadd.f32 %v667_v30, %v658_v25  ;;  %v797_v30 = vpop.permute.xlu0 %796 }
 0x314   :  { %689 = vmatmul.f32.vlgmr.msrb.gmra.mxu0 %v2170_v42  ;;  %709 = vmatmul.f32.vlgmr.msrb.gmra.mxu1 %v2170_v42 }
 0x315   :  { %729 = vmatmul.f32.vlgmr.msrb.gmra.mxu2 %v2170_v42  ;;  %977 = vmatpush.msrb.mxu0 %v2037_v6 }
 0x316   :  { %1069 = vmatpush.msrb.mxu1 %v2040_v9  ;;  %1089 = vmatpush.msrb.mxu2 %v2043_v10  ;;  %v2214_v9 = vld [vmem:[#allocation7 + $0x120] sm:$0xff]  ;;  %v2219_v10 = vld [vmem:[#allocation7 + $0x118] sm:$0xff] }
 0x317   :  { %978 = vmatpush.msrb.mxu0 %v2046_v38 }
 0x318   :  { %1070 = vmatpush.msrb.mxu1 %v2049_v11  ;;  %1090 = vmatpush.msrb.mxu2 %v2052_v12  ;;  %v2224_v11 = vld [vmem:[#allocation7 + $0x110] sm:$0xff]  ;;  %v2229_v12 = vld [vmem:[#allocation7 + $0x108] sm:$0xff] }
 0x319   :  { %979 = vmatpush.msrb.mxu0 %v2055_v13 }
 0x31a   :  { %1071 = vmatpush.msrb.mxu1 %v2058_v14  ;;  %1091 = vmatpush.msrb.mxu2 %v2061_v16  ;;  %v2234_v14 = vld [vmem:[#allocation7 + $0x100] sm:$0xff] }
 0x31b   :  { %980 = vmatpush.msrb.mxu0 %v2064_v18  ;;  %v670_v16 = vld [vmem:[#allocation4 + $0x60] sm:$0xff] }
 0x31c   :  { %1072 = vmatpush.msrb.mxu1 %v2067_v19  ;;  %1092 = vmatpush.msrb.mxu2 %v2070_v20  ;;  %v671_v20 = vld [vmem:[#allocation4 + $0x68] sm:$0xff] }
 0x31d   :  { %981 = vmatpush.msrb.mxu0 %v2073_v21 }
 0x31e   :  { %1073 = vmatpush.msrb.mxu1 %v2076_v22  ;;  %1093 = vmatpush.msrb.mxu2 %v2079_v23  ;;  %v2392_v23 = vld [vmem:[#allocation28_spill] sm:$0xff] }
 0x31f   :  { %982 = vmatpush.msrb.mxu0 %v2082_v24 }
 0x320   :  { %1074 = vmatpush.msrb.mxu1 %v2085_v26  ;;  %1094 = vmatpush.msrb.mxu2 %v2088_v27  ;;  %v2393_v27 = vld [vmem:[#allocation29_spill] sm:$0xff] }
 0x321   :  { %983 = vmatpush.msrb.mxu0 %v2091_v28 }
 0x322   :  { %1075 = vmatpush.msrb.mxu1 %v2094_v31  ;;  %1095 = vmatpush.msrb.mxu2 %v2097_v32 }
 0x323   :  { %984 = vmatpush.msrb.mxu0 %v2100_v33 }
 0x324   :  { %1076 = vmatpush.msrb.mxu1 %v2103_v34  ;;  %1096 = vmatpush.msrb.mxu2 %v2106_v35 }
 0x325   :  { %985 = vmatpush.msrb.mxu0 %v2199_v15 }
 0x326   :  { %1077 = vmatpush.msrb.mxu1 %v2110_v36  ;;  %1097 = vmatpush.msrb.mxu2 %v2113_v37 }
 0x327   :  { %986 = vmatpush.msrb.mxu0 %v2204_v17 }
 0x328   :  { %1078 = vmatpush.msrb.mxu1 %v2117_v45  ;;  %1098 = vmatpush.msrb.mxu2 %v2120_v54 }
 0x329   :  { %987 = vmatpush.msrb.mxu0 %v2209_v5 }
 0x32a   :  { %1079 = vmatpush.msrb.mxu1 %v2124_v41  ;;  %1099 = vmatpush.msrb.mxu2 %v2127_v57 }
 0x32b   :  { %988 = vmatpush.msrb.mxu0 %v2214_v9 }
 0x32c   :  { %1080 = vmatpush.msrb.mxu1 %v2131_v44  ;;  %1100 = vmatpush.msrb.mxu2 %v2134_v1 }
 0x32d   :  { %989 = vmatpush.msrb.mxu0 %v2219_v10 }
 0x32e   :  { %1081 = vmatpush.msrb.mxu1 %v2138_v47  ;;  %1101 = vmatpush.msrb.mxu2 %v2141_v48 }
 0x32f   :  { %990 = vmatpush.msrb.mxu0 %v2224_v11 }
 0x330   :  { %1082 = vmatpush.msrb.mxu1 %v2145_v52  ;;  %1102 = vmatpush.msrb.mxu2 %v2148_v50 }
 0x331   :  { %991 = vmatpush.msrb.mxu0 %v2229_v12 }
 0x332   :  { %1083 = vmatpush.msrb.mxu1 %v2152_v51  ;;  %1103 = vmatpush.msrb.mxu2 %v2155_v60 }
 0x333   :  { %992 = vmatpush.msrb.mxu0 %v2234_v14 }
 0x334   :  { %1084 = vmatpush.msrb.mxu1 %v2159_v63  ;;  %1104 = vmatpush.msrb.mxu2 %v2162_v8 }
 0x391   :  { %v690_v19 = vpop.f32.mrf.mxu0  ;;  %v710_v22 = vpop.f32.mrf.mxu1 }
 0x392   :  { %v691_v26 = vadd.f32 %v2392_v23, %v690_v19  ;;  %v711_v31 = vadd.f32 %v2393_v27, %v710_v22 }
 0x394   :  { %v733_v32 = vadd.f32 %v691_v26, %v670_v16  ;;  %v753_v34 = vadd.f32 %v711_v31, %v671_v20  ;;  %v788_v16 = vpop.permute.xlu2 %787  ;;  %v799_v20 = vmul.f32 %v797_v30, %v2170_v42 }
 0x396   :  { %v1256_v35 = vmul.f32 -1.442695, %v733_v32  ;;  %v1257_v36 = vmul.f32 -1.442695, %v753_v34 }
 0x398   :  { %1328 = vpow2.f32 %v1256_v35  ;;  %v730_v8 = vpop.f32.mrf.mxu2 }
 0x399   :  { %1330 = vpow2.f32 %v1257_v36  ;;  %v731_v53 = vadd.f32 %v1908_v49, %v730_v8 }
 0x39e   :  { %v1329_v37 = vpop.eup %1328 }
 0x39f   :  { %v1331_v45 = vpop.eup %1330  ;;  %v737_v54 = vadd.f32 1.0, %v1329_v37 }
 0x3a0   :  { %v757_v41 = vadd.f32 1.0, %v1331_v45 }
 0x3a1   :  { %1332 = vrcp.f32 %v737_v54  ;;  %v749_v50 = vand.u32 2147483648, %v737_v54  ;;  %v747_v60 = vand.u32 2147483647, %v737_v54  ;;  %vm743_vm9 = vweird.f32 %v737_v54 }
 0x3a2   :  { %1334 = vrcp.f32 %v757_v41  ;;  %v769_v2 = vand.u32 2147483648, %v757_v41  ;;  %vm763_vm13 = vweird.f32 %v757_v41  ;;  %v767_v0 = vand.u32 2147483647, %v757_v41 }
 0x3a3   :  { %v750_v7 = vor.u32 1.1754944e-38, %v749_v50  ;;  %vm748_vm11 = vcmp.eq.f32.partialorder %v747_v60, 8.507059e+37 }
 0x3a4   :  { %v770_v59 = vor.u32 1.1754944e-38, %v769_v2  ;;  %vm768_vm15 = vcmp.eq.f32.partialorder %v767_v0, 8.507059e+37  ;;  %v920_v2 = vpop.permute.xlu1 %919 }
 0x3a7   :  { %v1333_v57 = vpop.eup %1332 }
 0x3a8   :  { %v1335_v44 = vpop.eup %1334  ;;  %v739_v1 = vmul.f32 %v1333_v57, %v737_v54  ;;  %vm744_vm8 = vweird.f32 %v1333_v57 }
 0x3a9   :  { %v759_v47 = vmul.f32 %v1335_v44, %v757_v41  ;;  %vm745_vm10 = vmor %vm743_vm9, %vm744_vm8  ;;  %vm764_vm12 = vweird.f32 %v1335_v44 }
 0x3aa   :  { %v740_v48 = vsub.f32 1.0, %v739_v1  ;;  %vm765_vm14 = vmor %vm763_vm13, %vm764_vm12 }
 0x3ab   :  { %v760_v52 = vsub.f32 1.0, %v759_v47 }
 0x3ac   :  { %v741_v51 = vmul.f32 %v1333_v57, %v740_v48  ;;  %v804_v48 = vld [vmem:[#allocation4 + $0x88] sm:$0xff] }
 0x3ad   :  { %v761_v63 = vmul.f32 %v1335_v44, %v760_v52 }
 0x3ae   :  { %v742_v29 = vadd.f32 %v1333_v57, %v741_v51 }
 0x3af   :  { %v762_v56 = vadd.f32 %v1335_v44, %v761_v63 }
 0x3b0   :  { %v746_v46 = vsel %vm745_vm10, %v1333_v57, %v742_v29  ;;  %v2280_v57 = vld [vmem:[%s2318_s4 + $0x2] ss:$0 sm:$0xff] }
 0x3b1   :  { %v751_v39 = vsel %vm748_vm11, %v750_v7, %v746_v46  ;;  %v766_v4 = vsel %vm765_vm14, %v1335_v44, %v762_v56 }
 0x3b2   :  { %v773_v58 = vmul.f32 %v751_v39, %v731_v53  ;;  %v771_v3 = vsel %vm768_vm15, %v770_v59, %v766_v4  ;;  %v934_v59 = vld [vmem:[#allocation4 + $0x90] sm:$0xff] }
 0x3b3   :  { %v776_v62 = vsub.f32 1.0, %v771_v3  ;;  %v778_v61 = vmul.f32 %v771_v3, %v2170_v42  ;;  %v2274_v42 = vld [vmem:[%s2318_s4] ss:$0 sm:$0xff] }
 0x3b4   :  { %v774_v43 = vadd.f32 %v773_v58, %v672_v40  ;;  %v929_v58 = vpop.permute.xlu2 %928 }
 0x3b6   :  { %1336 = vtanh.f32 %v774_v43 }
 0x3bc   :  { %v1337_v55 = vpop.eup %1336 }
 0x3bd   :  { %v777_v49 = vmul.f32 %v1337_v55, %v776_v62  ;;  %v935_v62 = vld [vmem:[#allocation4 + $0x98] sm:$0xff] }
 0x3bf   :  { %v779_v25 = vadd.f32 %v778_v61, %v777_v49 }
 0x3c1   :  { %v790_v19 = vmul.f32 %v788_v16, %v779_v25 }
 0x3c3   :  { %792 = vst [vmem:[#allocation9 + $0x20] sm:$0xff] %v790_v19  ;;  %v2244_v22 = vadd.f32 %v799_v20, %v790_v19 }
 0x3c5   :  { %821 = vmatmul.f32.vlgmr.msrb.gmra.mxu3 %v2244_v22  ;;  %841 = vmatmul.f32.vlgmr.msra.gmra.mxu0 %v2244_v22  ;;  %v931_v43 = vmul.f32 %v929_v58, %v2244_v22 }
 0x3c6   :  { %861 = vmatmul.f32.vlgmr.msra.gmra.mxu1 %v2244_v22  ;;  %1109 = vmatpush.msrb.mxu3 %v2037_v6  ;;  %v803_v6 = vld [vmem:[#allocation4 + $0x80] sm:$0xff] }
 0x3c8   :  { %1110 = vmatpush.msrb.mxu3 %v2046_v38 }
 0x3ca   :  { %1111 = vmatpush.msrb.mxu3 %v2055_v13  ;;  %v2268_v13 = vld [vmem:[%s2318_s4 + $0x1] ss:$0 sm:$0xff] }
 0x3cc   :  { %1112 = vmatpush.msrb.mxu3 %v2064_v18 }
 0x3ce   :  { %1113 = vmatpush.msrb.mxu3 %v2073_v21 }
 0x3d0   :  { %1114 = vmatpush.msrb.mxu3 %v2082_v24 }
 0x3d2   :  { %1115 = vmatpush.msrb.mxu3 %v2091_v28  ;;  %v802_v28 = vld [vmem:[#allocation4 + $0x78] sm:$0xff] }
 0x3d4   :  { %1116 = vmatpush.msrb.mxu3 %v2100_v33 }
 0x3d6   :  { %1117 = vmatpush.msrb.mxu3 %v2199_v15 }
 0x3d8   :  { %1118 = vmatpush.msrb.mxu3 %v2204_v17 }
 0x3da   :  { %1119 = vmatpush.msrb.mxu3 %v2209_v5 }
 0x3dc   :  { %1120 = vmatpush.msrb.mxu3 %v2214_v9 }
 0x3de   :  { %1121 = vmatpush.msrb.mxu3 %v2219_v10 }
 0x3e0   :  { %1122 = vmatpush.msrb.mxu3 %v2224_v11 }
 0x3e2   :  { %1123 = vmatpush.msrb.mxu3 %v2229_v12 }
 0x3e4   :  { %1124 = vmatpush.msrb.mxu3 %v2234_v14 }
 0x442   :  { %v842_v38 = vpop.f32.mrf.mxu0 }
 0x443   :  { %v843_v18 = vadd.f32 %v2268_v13, %v842_v38  ;;  %v862_v45 = vpop.f32.mrf.mxu1 }
 0x444   :  { %v863_v44 = vadd.f32 %v2280_v57, %v862_v45 }
 0x445   :  { %v885_v21 = vadd.f32 %v843_v18, %v803_v6 }
 0x447   :  { %v1261_v24 = vmul.f32 -1.442695, %v885_v21 }
 0x448   :  { %v822_v33 = vpop.f32.mrf.mxu3 }
 0x449   :  { %1338 = vpow2.f32 %v1261_v24  ;;  %v823_v15 = vadd.f32 %v2274_v42, %v822_v33 }
 0x44b   :  { %v865_v17 = vadd.f32 %v823_v15, %v802_v28 }
 0x44d   :  { %v1260_v5 = vmul.f32 -1.442695, %v865_v17 }
 0x44f   :  { %v1339_v9 = vpop.eup %1338  ;;  %1340 = vpow2.f32 %v1260_v5 }
 0x450   :  { %v889_v10 = vadd.f32 1.0, %v1339_v9 }
 0x452   :  { %1342 = vrcp.f32 %v889_v10  ;;  %v901_v50 = vand.u32 2147483648, %v889_v10  ;;  %vm895_vm5 = vweird.f32 %v889_v10  ;;  %v899_v60 = vand.u32 2147483647, %v889_v10 }
 0x454   :  { %v902_v29 = vor.u32 1.1754944e-38, %v901_v50  ;;  %vm900_vm7 = vcmp.eq.f32.partialorder %v899_v60, 8.507059e+37  ;;  %v1052_v50 = vpop.permute.xlu0 %1051 }
 0x455   :  { %v1341_v11 = vpop.eup %1340 }
 0x456   :  { %v869_v12 = vadd.f32 1.0, %v1341_v11 }
 0x458   :  { %1344 = vrcp.f32 %v869_v12  ;;  %v1343_v14 = vpop.eup %1342  ;;  %v881_v34 = vand.u32 2147483648, %v869_v12  ;;  %v879_v36 = vand.u32 2147483647, %v869_v12  ;;  %vm875_vm1 = vweird.f32 %v869_v12 }
 0x459   :  { %v891_v23 = vmul.f32 %v1343_v14, %v889_v10  ;;  %vm896_vm4 = vweird.f32 %v1343_v14 }
 0x45a   :  { %v882_v41 = vor.u32 1.1754944e-38, %v881_v34  ;;  %vm880_vm3 = vcmp.eq.f32.partialorder %v879_v36, 8.507059e+37  ;;  %vm897_vm6 = vmor %vm895_vm5, %vm896_vm4 }
 0x45b   :  { %v892_v31 = vsub.f32 1.0, %v891_v23 }
 0x45d   :  { %v893_v37 = vmul.f32 %v1343_v14, %v892_v31 }
 0x45e   :  { %v1345_v26 = vpop.eup %1344 }
 0x45f   :  { %v871_v27 = vmul.f32 %v1345_v26, %v869_v12  ;;  %vm876_vm0 = vweird.f32 %v1345_v26  ;;  %v894_v47 = vadd.f32 %v1343_v14, %v893_v37 }
 0x460   :  { %vm877_vm2 = vmor %vm875_vm1, %vm876_vm0 }
 0x461   :  { %v872_v32 = vsub.f32 1.0, %v871_v27  ;;  %v898_v8 = vsel %vm897_vm6, %v1343_v14, %v894_v47  ;;  %v936_v27 = vld [vmem:[#allocation4 + $0xa0] sm:$0xff] }
 0x462   :  { %v903_v7 = vsel %vm900_vm7, %v902_v29, %v898_v8  ;;  %v1066_v29 = vld [vmem:[#allocation4 + $0xa8] sm:$0xff] }
 0x463   :  { %v873_v35 = vmul.f32 %v1345_v26, %v872_v32  ;;  %v908_v53 = vsub.f32 1.0, %v903_v7  ;;  %v910_v39 = vmul.f32 %v903_v7, %v2244_v22 }
 0x465   :  { %v874_v54 = vadd.f32 %v1345_v26, %v873_v35 }
 0x467   :  { %v878_v1 = vsel %vm877_vm2, %v1345_v26, %v874_v54 }
 0x468   :  { %v883_v52 = vsel %vm880_vm3, %v882_v41, %v878_v1 }
 0x469   :  { %v905_v51 = vmul.f32 %v883_v52, %v863_v44 }
 0x46b   :  { %v906_v63 = vadd.f32 %v905_v51, %v804_v48  ;;  %v1061_v51 = vpop.permute.xlu1 %1060 }
 0x46d   :  { %1346 = vtanh.f32 %v906_v63 }
 0x473   :  { %v1347_v46 = vpop.eup %1346 }
 0x474   :  { %v909_v40 = vmul.f32 %v1347_v46, %v908_v53 }
 0x476   :  { %v911_v56 = vadd.f32 %v910_v39, %v909_v40  ;;  %v1067_v39 = vld [vmem:[#allocation4 + $0xb0] sm:$0xff] }
 0x478   :  { %v922_v0 = vmul.f32 %v920_v2, %v911_v56 }
 0x47a   :  { %924 = vst [vmem:[#allocation9 + $0x28] sm:$0xff] %v922_v0  ;;  %v2285_v4 = vadd.f32 %v931_v43, %v922_v0 }
 0x47c   :  { %953 = vmatmul.f32.vlgmr.msra.gmra.mxu2 %v2285_v4  ;;  %973 = vmatmul.f32.vlgmr.msra.gmra.mxu3 %v2285_v4  ;;  %v1063_v63 = vmul.f32 %v1061_v51, %v2285_v4 }
 0x47d   :  { %993 = vmatmul.f32.vlgmr.msrb.gmra.mxu0 %v2285_v4 }
 0x4fa   :  { %v994_v10 = vpop.f32.mrf.mxu0 }
 0x4fb   :  { %v995_v23 = vadd.f32 %v2280_v57, %v994_v10 }
 0x4ff   :  { %v954_v3 = vpop.f32.mrf.mxu2  ;;  %v974_v55 = vpop.f32.mrf.mxu3 }
 0x500   :  { %v955_v49 = vadd.f32 %v2274_v42, %v954_v3  ;;  %v975_v61 = vadd.f32 %v2268_v13, %v974_v55 }
 0x502   :  { %v997_v25 = vadd.f32 %v955_v49, %v934_v59  ;;  %v1017_v30 = vadd.f32 %v975_v61, %v935_v62 }
 0x504   :  { %v1264_v16 = vmul.f32 -1.442695, %v997_v25  ;;  %v1265_v19 = vmul.f32 -1.442695, %v1017_v30 }
 0x506   :  { %1348 = vpow2.f32 %v1264_v16 }
 0x507   :  { %1350 = vpow2.f32 %v1265_v19 }
 0x50c   :  { %v1349_v20 = vpop.eup %1348 }
 0x50d   :  { %v1351_v22 = vpop.eup %1350  ;;  %v1001_v6 = vadd.f32 1.0, %v1349_v20 }
 0x50e   :  { %v1021_v38 = vadd.f32 1.0, %v1351_v22 }
 0x50f   :  { %1352 = vrcp.f32 %v1001_v6  ;;  %v1013_v15 = vand.u32 2147483648, %v1001_v6  ;;  %v1011_v9 = vand.u32 2147483647, %v1001_v6  ;;  %vm1007_vm9 = vweird.f32 %v1001_v6 }
 0x510   :  { %1354 = vrcp.f32 %v1021_v38  ;;  %v1033_v35 = vand.u32 2147483648, %v1021_v38  ;;  %vm1027_vm13 = vweird.f32 %v1021_v38  ;;  %v1031_v36 = vand.u32 2147483647, %v1021_v38 }
 0x511   :  { %v1014_v14 = vor.u32 1.1754944e-38, %v1013_v15  ;;  %vm1012_vm11 = vcmp.eq.f32.partialorder %v1011_v9, 8.507059e+37 }
 0x512   :  { %v1034_v54 = vor.u32 1.1754944e-38, %v1033_v35  ;;  %vm1032_vm15 = vcmp.eq.f32.partialorder %v1031_v36, 8.507059e+37 }
 0x515   :  { %v1353_v18 = vpop.eup %1352 }
 0x516   :  { %v1355_v21 = vpop.eup %1354  ;;  %v1003_v24 = vmul.f32 %v1353_v18, %v1001_v6  ;;  %vm1008_vm8 = vweird.f32 %v1353_v18 }
 0x517   :  { %v1023_v28 = vmul.f32 %v1355_v21, %v1021_v38  ;;  %vm1009_vm10 = vmor %vm1007_vm9, %vm1008_vm8  ;;  %vm1028_vm12 = vweird.f32 %v1355_v21 }
 0x518   :  { %v1004_v33 = vsub.f32 1.0, %v1003_v24  ;;  %vm1029_vm14 = vmor %vm1027_vm13, %vm1028_vm12 }
 0x519   :  { %v1024_v17 = vsub.f32 1.0, %v1023_v28 }
 0x51a   :  { %v1005_v5 = vmul.f32 %v1353_v18, %v1004_v33 }
 0x51b   :  { %v1025_v11 = vmul.f32 %v1355_v21, %v1024_v17 }
 0x51c   :  { %v1006_v12 = vadd.f32 %v1353_v18, %v1005_v5 }
 0x51d   :  { %v1026_v32 = vadd.f32 %v1355_v21, %v1025_v11 }
 0x51e   :  { %v1010_v26 = vsel %vm1009_vm10, %v1353_v18, %v1006_v12  ;;  %v1068_v18 = vld [vmem:[#allocation4 + $0xb8] sm:$0xff] }
 0x51f   :  { %v1015_v31 = vsel %vm1012_vm11, %v1014_v14, %v1010_v26  ;;  %v1030_v45 = vsel %vm1029_vm14, %v1355_v21, %v1026_v32 }
 0x520   :  { %v1037_v34 = vmul.f32 %v1015_v31, %v995_v23  ;;  %v1035_v41 = vsel %vm1032_vm15, %v1034_v54, %v1030_v45  ;;  %v1184_v31 = vpop.permute.xlu2 %1183 }
 0x521   :  { %v1040_v44 = vsub.f32 1.0, %v1035_v41  ;;  %v1042_v48 = vmul.f32 %v1035_v41, %v2285_v4 }
 0x522   :  { %v1038_v37 = vadd.f32 %v1037_v34, %v936_v27  ;;  %v1193_v27 = vpop.permute.xlu0 %1192 }
 0x524   :  { %1356 = vtanh.f32 %v1038_v37 }
 0x52a   :  { %v1357_v1 = vpop.eup %1356 }
 0x52b   :  { %v1041_v47 = vmul.f32 %v1357_v1, %v1040_v44 }
 0x52d   :  { %v1043_v52 = vadd.f32 %v1042_v48, %v1041_v47 }
 0x52f   :  { %v1054_v60 = vmul.f32 %v1052_v50, %v1043_v52 }
 0x531   :  { %1056 = vst [vmem:[#allocation9 + $0x30] sm:$0xff] %v1054_v60  ;;  %v2295_v8 = vadd.f32 %v1063_v63, %v1054_v60 }
 0x533   :  { %1085 = vmatmul.f32.vlgmr.msrb.gmra.mxu1 %v2295_v8  ;;  %1105 = vmatmul.f32.vlgmr.msrb.gmra.mxu2 %v2295_v8  ;;  %v1195_v34 = vmul.f32 %v1193_v27, %v2295_v8 }
 0x534   :  { %1125 = vmatmul.f32.vlgmr.msrb.gmra.mxu3 %v2295_v8 }
 0x5b0   :  { %v1086_v7 = vpop.f32.mrf.mxu1 }
 0x5b1   :  { %v1087_v53 = vadd.f32 %v2274_v42, %v1086_v7 }
 0x5b3   :  { %v1129_v46 = vadd.f32 %v1087_v53, %v1066_v29 }
 0x5b5   :  { %v1268_v40 = vmul.f32 -1.442695, %v1129_v46 }
 0x5b6   :  { %v1106_v56 = vpop.f32.mrf.mxu2 }
 0x5b7   :  { %1358 = vpow2.f32 %v1268_v40  ;;  %v1107_v2 = vadd.f32 %v2268_v13, %v1106_v56  ;;  %v1126_v16 = vpop.f32.mrf.mxu3 }
 0x5b8   :  { %v1127_v6 = vadd.f32 %v2280_v57, %v1126_v16 }
 0x5b9   :  { %v1149_v58 = vadd.f32 %v1107_v2, %v1067_v39 }
 0x5bb   :  { %v1269_v0 = vmul.f32 -1.442695, %v1149_v58 }
 0x5bd   :  { %v1359_v43 = vpop.eup %1358  ;;  %1360 = vpow2.f32 %v1269_v0 }
 0x5be   :  { %v1133_v4 = vadd.f32 1.0, %v1359_v43 }
 0x5c0   :  { %1362 = vrcp.f32 %v1133_v4  ;;  %v1145_v42 = vand.u32 2147483648, %v1133_v4  ;;  %v1143_v25 = vand.u32 2147483647, %v1133_v4  ;;  %vm1139_vm1 = vweird.f32 %v1133_v4 }
 0x5c2   :  { %v1146_v20 = vor.u32 1.1754944e-38, %v1145_v42  ;;  %vm1144_vm3 = vcmp.eq.f32.partialorder %v1143_v25, 8.507059e+37 }
 0x5c3   :  { %v1361_v59 = vpop.eup %1360 }
 0x5c4   :  { %v1153_v3 = vadd.f32 1.0, %v1361_v59 }
 0x5c6   :  { %v1363_v62 = vpop.eup %1362  ;;  %1364 = vrcp.f32 %v1153_v3  ;;  %v1165_v28 = vand.u32 2147483648, %v1153_v3  ;;  %v1163_v15 = vand.u32 2147483647, %v1153_v3  ;;  %vm1159_vm5 = vweird.f32 %v1153_v3 }
 0x5c7   :  { %v1135_v55 = vmul.f32 %v1363_v62, %v1133_v4  ;;  %vm1140_vm0 = vweird.f32 %v1363_v62 }
 0x5c8   :  { %vm1141_vm2 = vmor %vm1139_vm1, %vm1140_vm0  ;;  %v1166_v9 = vor.u32 1.1754944e-38, %v1165_v28  ;;  %vm1164_vm7 = vcmp.eq.f32.partialorder %v1163_v15, 8.507059e+37 }
 0x5c9   :  { %v1136_v49 = vsub.f32 1.0, %v1135_v55 }
 0x5cb   :  { %v1137_v61 = vmul.f32 %v1363_v62, %v1136_v49 }
 0x5cc   :  { %v1365_v30 = vpop.eup %1364 }
 0x5cd   :  { %v1155_v19 = vmul.f32 %v1365_v30, %v1153_v3  ;;  %v1138_v13 = vadd.f32 %v1363_v62, %v1137_v61  ;;  %vm1160_vm4 = vweird.f32 %v1365_v30 }
 0x5ce   :  { %vm1161_vm6 = vmor %vm1159_vm5, %vm1160_vm4 }
 0x5cf   :  { %v1156_v22 = vsub.f32 1.0, %v1155_v19  ;;  %v1142_v38 = vsel %vm1141_vm2, %v1363_v62, %v1138_v13 }
 0x5d0   :  { %v1147_v21 = vsel %vm1144_vm3, %v1146_v20, %v1142_v38 }
 0x5d1   :  { %v1157_v24 = vmul.f32 %v1365_v30, %v1156_v22  ;;  %v1169_v33 = vmul.f32 %v1147_v21, %v1127_v6 }
 0x5d3   :  { %v1158_v17 = vadd.f32 %v1365_v30, %v1157_v24  ;;  %v1170_v5 = vadd.f32 %v1169_v33, %v1068_v18 }
 0x5d5   :  { %v1162_v10 = vsel %vm1161_vm6, %v1365_v30, %v1158_v17  ;;  %1366 = vtanh.f32 %v1170_v5 }
 0x5d6   :  { %v1167_v11 = vsel %vm1164_vm7, %v1166_v9, %v1162_v10 }
 0x5d7   :  { %v1172_v12 = vsub.f32 1.0, %v1167_v11  ;;  %v1174_v23 = vmul.f32 %v1167_v11, %v2295_v8 }
 0x5db   :  { %v1367_v57 = vpop.eup %1366 }
 0x5dc   :  { %v1173_v14 = vmul.f32 %v1367_v57, %v1172_v12 }
 0x5de   :  { %v1175_v26 = vadd.f32 %v1174_v23, %v1173_v14 }
 0x5e0   :  { %v1186_v32 = vmul.f32 %v1184_v31, %v1175_v26 }
 0x5e2   :  { %1188 = vst [vmem:[#allocation9 + $0x38] sm:$0xff] %v1186_v32  ;;  %v1196_v35 = vadd.f32 %v1195_v34, %v1186_v32 }
 0x5e4   :  { %1197 = vst [vmem:[#allocation10] sm:$0xff] %v1196_v35 }
 0x5e5 PF:  { %s1204_s24 = sshll.u32 %s2319_s5, 4  ;;  %s1531_s25 = smov [#allocation9]   ;;  %s1205_s24 = int_to_ptr.hbm [resolvable:$true] %s1204_s24 }
 0x5e6   :  { %s1202_s26 = sshll.u32 %s1531_s25, 4  ;;  %s1532_s27 = smov [#allocation10]   ;;  %s1203_s26 = int_to_ptr.vmem [resolvable:$true] %s1202_s26 }
 0x5e7   :  { %1210 = dma.vmem_to_hbm [thread:$0]  %s1203_s26, 1024, %s1205_s24, [#allocation6], %s1524_s29, %s1524_s29, %s1525_s30  }
 0x5e8   :  { %s1216_s28 = sshll.u32 %s1532_s27, 4  ;;  %s1218_s1 = sshll.u32 %s2320_s6, 4  ;;  %s1217_s28 = int_to_ptr.vmem [resolvable:$true] %s1216_s28  ;;  %s1219_s1 = int_to_ptr.hbm [resolvable:$true] %s1218_s1 }
 0x5e9   :  { %1221 = dma.vmem_to_hbm [thread:$0]  %s1217_s28, 128, %s1219_s1, [#allocation11]  }
 0x5ea   :  { %1519 = dma.done.wait [#allocation6], 1024  }
 0x5eb   :  { %1520 = vsyncadd [#allocation6], 4294966272 }
 0x5ec   :  { %1521 = dma.done.wait [#allocation11], 128  }
 0x5ed   :  { %1522 = vsyncadd [#allocation11], 4294967168 }
 0x5ee   :  { %1230 = vsyncpa [#allocation5], 1 }
 0x5ef   :  { %1231 = vsyncpa [#allocation8], 1 }
 0x5f0   :  { %1232 = vsyncpa [#allocation6], 1 }
 0x5f1   :  { %1233 = vsyncpa [#allocation11], 1 }

</bundles_post_ra>
